<compile_context>
chip_gen: v7x
topology: tpu7x:2x2x1
jax: 0.10.0
libtpu: 0.0.40
codegen_flags: <defaults>
</compile_context>

<pallas_src>
import jax
import jax.numpy as jnp
from jax.experimental import pallas as pl
from jax.experimental.pallas import tpu as pltpu


# ----------------------------- helpers ------------------------------------ #

def _pick_time_chunk(T, max_chunk=64):
    """Largest divisor of T that is <= max_chunk (bounds the gx VMEM buffer)."""
    if T <= max_chunk:
        return T
    for tc in range(max_chunk, 0, -1):
        if T % tc == 0:
            return tc
    return T


def _reorder_gate_cols(w_t, D):
    """PyTorch gate order along the 4D axis is [i, f, g, o] -> kernel wants
    [i, f, o, g] so sigmoid/tanh each hit one contiguous slab."""
    return jnp.concatenate(
        [w_t[..., :2 * D], w_t[..., 3 * D:4 * D], w_t[..., 2 * D:3 * D]],
        axis=-1)


def _vmem_limit_bytes(T, Tc, B_pad, D, act_bytes, mxu_bytes):
    need = (
        2 * T * B_pad * D * act_bytes          # x input (double-buffer worst case)
        + T * B_pad * D * act_bytes            # resident output / working slab
        + 2 * 2 * D * 4 * D * mxu_bytes        # W_ih^T + W_hh^T, double-buffered
        + 2 * 4 * D * 4                        # bias, double-buffered
        + 2 * 2 * B_pad * D * 4                # h0 + c0, double-buffered
        + Tc * B_pad * 4 * D * 4               # chunked gx scratch (f32)
        + 2 * B_pad * D * 4                    # h, c scratch (f32)
    )
    try:
        phys = getattr(pltpu.get_tpu_info(), "vmem_capacity_bytes",
                       64 * 1024 * 1024)
    except Exception:
        phys = 64 * 1024 * 1024
    # ~110 MiB budget on 128-MiB parts (v5e/v6e), ~56 MiB on 64-MiB parts (v7x).
    cap = 110 * 1024 * 1024 if phys >= 100 * 1024 * 1024 else 56 * 1024 * 1024
    return int(min(max(int(need * 1.4), 16 * 1024 * 1024), cap))


# ----------------------------- Pallas kernel ------------------------------ #

def _make_decoder_kernel(T, Tc, B, D, mxu_dtype):
    """B is the padded batch (multiple of 8 sublanes); Tc divides T."""
    n_chunks = T // Tc
    unroll = max(1, min(Tc, 8))      # bounded unroll: LLO visibility, no blowup

    def kernel(x_ref, h0_ref, c0_ref, wi_ref, wh_ref, b_ref, out_ref,
               gx_scr, h_scr, c_scr):
        # Layer 0: seed the working activation slab.  out_ref's block index never
        # changes across the layer grid axis, so it stays resident in VMEM for all
        # layers and is written back to HBM only once.
        @pl.when(pl.program_id(0) == 0)
        def _():
            out_ref[...] = x_ref[...].astype(out_ref.dtype)

        # Per-layer recurrent state (always f32).
        h_scr[...] = h0_ref[...]
        c_scr[...] = c0_ref[...]

        # Time is processed in chunks of Tc steps: the non-recurrent projection of
        # a whole chunk is ONE large MXU matmul (bias folded in once); only
        # h @ W_hh^T + gate math stays on the serial critical path.
        for chunk in range(n_chunks):                        # static, small
            base = chunk * Tc * B
            x_chunk = out_ref[pl.ds(base, Tc * B), :]        # prev layer / emb
            gx_scr[...] = (
                jnp.dot(x_chunk.astype(mxu_dtype), wi_ref[...],
                        preferred_element_type=jnp.float32)
                + b_ref[...])                                # (Tc*B, 4D) f32

            def step(t, carry, base=base):
                loc = pl.multiple_of(t * B, B)               # chunk-local row
                row = pl.multiple_of(base + t * B, B)        # global row
                # TODO(synk): with M = B_pad = 8 the recurrent matmul uses a tiny
                # fraction of the MXU and re-pushes W_hh every step; explicit MXU
                # staging (pltpu.matmul_push_rhs once per layer) or batching more
                # sequences would lift this, when the workload allows.
                gates = (gx_scr[pl.ds(loc, B), :]
                         + jnp.dot(h_scr[...].astype(mxu_dtype), wh_ref[...],
                                   preferred_element_type=jnp.float32))
                # Gate columns are pre-ordered [i, f, o, g] by the wrapper:
                # sigmoid over one contiguous (B, 3D) slab, tanh over one (B, D).
                ifo = jax.nn.sigmoid(gates[:, 0:3 * D])
                g = jnp.tanh(gates[:, 3 * D:4 * D])
                i = ifo[:, 0:D]
                f = ifo[:, D:2 * D]
                o = ifo[:, 2 * D:3 * D]
                c_new = f * c_scr[...] + i * g
                h_new = o * jnp.tanh(c_new)
                c_scr[...] = c_new
                h_scr[...] = h_new
                # Overwrite the layer input in place with the layer output; this
                # chunk's input rows were fully consumed by the hoisted projection.
                out_ref[pl.ds(row, B), :] = h_new.astype(out_ref.dtype)
                return carry

            jax.lax.fori_loop(0, Tc, step, 0, unroll=unroll)

    return kernel


# ------------------------------ Decoder wrapper --------------------------- #

def decoder_forward(params, prev_tgt_tokens, hiddens, cells, n_layers,
                    mxu_dtype=jnp.float32, act_dtype=jnp.float32):
    """Mirrors Decoder.forward in eval mode (dropout = identity).

    prev_tgt_tokens: (B, T) int32
    hiddens, cells : (n_layers, B, D)
    mxu_dtype      : dtype fed to the MXU for the weight matmuls
                     (f32, or bf16 on v6e/v7x); gate math / h / c stay f32.
    act_dtype      : dtype of the resident activation slab (f32, or bf16 on v7x
                     to halve the second-largest persistent VMEM buffer).
    returns        : (B, T, D) decoder_out (batch_first, like nn.LSTM), f32.
    """
    B, T = prev_tgt_tokens.shape
    D = params["embedding"].shape[1]
    assert hiddens.shape == (n_layers, B, D) and cells.shape == (n_layers, B, D)
    # Layer 0 feeds embeddings straight into the LSTM: requires emb dim == hidden dim.
    assert params["w_ih_0"].shape == (4 * D, D)

    B_pad = ((B + 7) // 8) * 8            # pad batch to the 8-sublane tile
    Tc = _pick_time_chunk(T)

    # Embedding lookup gathers straight into the kernel's flat time-major layout.
    # TODO(synk): dropout is identity in eval mode; training-mode dropout (embedding
    # dropout + nn.LSTM inter-layer dropout) would need pltpu.prng_* masks in-kernel.
    emb_t = jnp.take(params["embedding"], prev_tgt_tokens.T, axis=0)   # (T, B, D)
    emb_t = jnp.pad(emb_t, ((0, 0), (0, B_pad - B), (0, 0)))           # pad rows inert
    x_flat = emb_t.reshape(T * B_pad, D).astype(act_dtype)

    h0 = jnp.pad(hiddens, ((0, 0), (0, B_pad - B), (0, 0))).astype(jnp.float32)
    c0 = jnp.pad(cells, ((0, 0), (0, B_pad - B), (0, 0))).astype(jnp.float32)

    # Per-layer weights, pre-transposed to (D, 4D), gate columns reordered to
    # [i, f, o, g]; the two biases summed once.
    wi = jnp.stack([_reorder_gate_cols(params[f"w_ih_{l}"].T, D)
                    for l in range(n_layers)]).astype(mxu_dtype)
    wh = jnp.stack([_reorder_gate_cols(params[f"w_hh_{l}"].T, D)
                    for l in range(n_layers)]).astype(mxu_dtype)
    b = jnp.stack([_reorder_gate_cols(
            (params[f"b_ih_{l}"] + params[f"b_hh_{l}"]).reshape(1, 4 * D), D)
        for l in range(n_layers)]).astype(jnp.float32)

    act_bytes = jnp.dtype(act_dtype).itemsize
    mxu_bytes = jnp.dtype(mxu_dtype).itemsize

    cost = pl.CostEstimate(
        flops=int(16 * n_layers * T * B_pad * D * D),
        transcendentals=int(5 * n_layers * T * B_pad * D),
        bytes_accessed=int(2 * T * B_pad * D * act_bytes
                           + n_layers * (2 * D * 4 * D * mxu_bytes
                                         + 4 * D * 4 + 2 * B_pad * D * 4)))

    # TODO(synk): at tiny D (e.g. the D=32 example) the per-step (8, D) stores use
    # quarter-filled vregs / masked vst; at D >= 128 multiples they are lane-dense.
    # TODO(synk): on v7x with real batch >= 16, split the batch over a 'parallel'
    # grid axis (or core_map) to use the second TensorCore.
    out_flat = pl.pallas_call(
        _make_decoder_kernel(T, Tc, B_pad, D, mxu_dtype),
        out_shape=jax.ShapeDtypeStruct((T * B_pad, D), act_dtype),
        grid_spec=pltpu.PrefetchScalarGridSpec(
            num_scalar_prefetch=0,
            grid=(n_layers,),                  # layer axis: weights stream per layer
            in_specs=[
                pl.BlockSpec((T * B_pad, D), lambda l: (0, 0)),         # x (flat, time-major)
                pl.BlockSpec((None, B_pad, D), lambda l: (l, 0, 0)),    # h0[l]
                pl.BlockSpec((None, B_pad, D), lambda l: (l, 0, 0)),    # c0[l]
                pl.BlockSpec((None, D, 4 * D), lambda l: (l, 0, 0)),    # W_ih^T[l]
                pl.BlockSpec((None, D, 4 * D), lambda l: (l, 0, 0)),    # W_hh^T[l]
                pl.BlockSpec((None, 1, 4 * D), lambda l: (l, 0, 0)),    # bias[l]
            ],
            out_specs=pl.BlockSpec((T * B_pad, D), lambda l: (0, 0)),   # resident slab
            scratch_shapes=[
                pltpu.VMEM((Tc * B_pad, 4 * D), jnp.float32),   # chunked input gates
                pltpu.VMEM((B_pad, D), jnp.float32),            # h state
                pltpu.VMEM((B_pad, D), jnp.float32),            # c state
            ],
        ),
        compiler_params=pltpu.CompilerParams(
            dimension_semantics=("arbitrary",),    # layers are sequential
            vmem_limit_bytes=_vmem_limit_bytes(T, Tc, B_pad, D,
                                               act_bytes, mxu_bytes)),
        cost_estimate=cost,
    )(x_flat, h0, c0, wi, wh, b)

    # Un-pad, restore f32, return batch_first.
    out = out_flat.reshape(T, B_pad, D)[:, :B, :].astype(jnp.float32)
    return jnp.swapaxes(out, 0, 1)                                     # (B, T, D)


# ------------------------------ JAX reference ------------------------------ #

def decoder_reference(params, prev_tgt_tokens, hiddens, cells, n_layers):
    emb = jnp.take(params["embedding"], prev_tgt_tokens, axis=0)       # (B, T, D)
    x = emb.astype(jnp.float32)
    for layer in range(n_layers):
        w_ih = params[f"w_ih_{layer}"]
        w_hh = params[f"w_hh_{layer}"]
        b = params[f"b_ih_{layer}"] + params[f"b_hh_{layer}"]

        def step(carry, xt, w_ih=w_ih, w_hh=w_hh, b=b):
            h, c = carry
            gates = xt @ w_ih.T + h @ w_hh.T + b
            i, f, g, o = jnp.split(gates, 4, axis=-1)
            i, f, o = jax.nn.sigmoid(i), jax.nn.sigmoid(f), jax.nn.sigmoid(o)
            g = jnp.tanh(g)
            c = f * c + i * g
            h = o * jnp.tanh(c)
            return (h, c), h

        _, ys = jax.lax.scan(step, (hiddens[layer], cells[layer]),
                             jnp.transpose(x, (1, 0, 2)))
        x = jnp.transpose(ys, (1, 0, 2))
    return x


# ------------------------------ main -------------------------------------- #

if __name__ == "__main__":
    # Small shapes consistent with the module.
    n_tgt_words, tgt_pdx = 16, 0
    d_model, n_layers = 32, 2
    B, T = 2, 8

    key = jax.random.PRNGKey(0)
    k_emb, k_tok, k_h, k_c, *k_w = jax.random.split(key, 5 + 4 * n_layers)

    scale = 1.0 / jnp.sqrt(d_model)
    embedding = jax.random.normal(k_emb, (n_tgt_words, d_model), jnp.float32)
    embedding = embedding.at[tgt_pdx].set(0.0)     # padding_idx row is zero

    params = {"embedding": embedding}
    for layer in range(n_layers):
        kw = k_w[4 * layer:4 * layer + 4]
        params[f"w_ih_{layer}"] = jax.random.uniform(
            kw[0], (4 * d_model, d_model), jnp.float32, -scale, scale)
        params[f"w_hh_{layer}"] = jax.random.uniform(
            kw[1], (4 * d_model, d_model), jnp.float32, -scale, scale)
        params[f"b_ih_{layer}"] = jax.random.uniform(
            kw[2], (4 * d_model,), jnp.float32, -scale, scale)
        params[f"b_hh_{layer}"] = jax.random.uniform(
            kw[3], (4 * d_model,), jnp.float32, -scale, scale)

    prev_tgt_tokens = jax.random.randint(k_tok, (B, T), 0, n_tgt_words, jnp.int32)
    hiddens = jax.random.normal(k_h, (n_layers, B, d_model), jnp.float32)
    cells = jax.random.normal(k_c, (n_layers, B, d_model), jnp.float32)

    ref = decoder_reference(params, prev_tgt_tokens, hiddens, cells, n_layers)

    # f32 path (v5e-friendly): strict check against the reference.
    out = decoder_forward(params, prev_tgt_tokens, hiddens, cells, n_layers,
                          mxu_dtype=jnp.float32, act_dtype=jnp.float32)
    out = jax.block_until_ready(out)
    assert out.shape == (B, T, d_model)
    assert jnp.allclose(out, ref, atol=1e-4, rtol=1e-4), "f32 mismatch vs reference"

    # bf16 weights + bf16 activation slab (v6e/v7x-friendly): looser tolerance.
    out_bf16 = decoder_forward(params, prev_tgt_tokens, hiddens, cells, n_layers,
                               mxu_dtype=jnp.bfloat16, act_dtype=jnp.bfloat16)
    out_bf16 = jax.block_until_ready(out_bf16)
    assert out_bf16.shape == (B, T, d_model)
    assert jnp.allclose(out_bf16, ref, atol=5e-2, rtol=5e-2), "bf16 mismatch vs reference"

    print("KERNEL_OK")
</pallas_src>

<mosaic_0001>
module attributes {stable_mosaic.version = 11 : i64} {
  func.func @kernel(%arg0: i32, %arg1: memref<64x32xf32, #tpu.memory_space<vmem>>, %arg2: memref<1x8x32xf32, #tpu.memory_space<vmem>>, %arg3: memref<1x8x32xf32, #tpu.memory_space<vmem>>, %arg4: memref<1x32x128xf32, #tpu.memory_space<vmem>>, %arg5: memref<1x32x128xf32, #tpu.memory_space<vmem>>, %arg6: memref<1x1x128xf32, #tpu.memory_space<vmem>>, %arg7: memref<64x32xf32, #tpu.memory_space<vmem>>, %arg8: memref<64x128xf32, #tpu.memory_space<vmem>>, %arg9: memref<8x32xf32, #tpu.memory_space<vmem>>, %arg10: memref<8x32xf32, #tpu.memory_space<vmem>>) attributes {dimension_semantics = [#tpu.dimension_semantics<arbitrary>], iteration_bounds = array<i64: 2>, scalar_prefetch = 0 : i64, scratch_operands = 3 : i64, tpu.core_type = #tpu.core_type<tc>, window_params = [{pipeline_mode = #tpu.pipeline_mode<synchronous>, transform_indices = @transform_0, window_bounds = array<i64: 64, 32>}, {transform_indices = @transform_1, window_bounds = array<i64: 1, 8, 32>}, {transform_indices = @transform_2, window_bounds = array<i64: 1, 8, 32>}, {transform_indices = @transform_3, window_bounds = array<i64: 1, 32, 128>}, {transform_indices = @transform_4, window_bounds = array<i64: 1, 32, 128>}, {transform_indices = @transform_5, window_bounds = array<i64: 1, 1, 128>}, {pipeline_mode = #tpu.pipeline_mode<synchronous>, transform_indices = @transform_6, window_bounds = array<i64: 64, 32>}]} {
    %c0_i32 = arith.constant 0 : i32
    %0 = arith.cmpi eq, %arg0, %c0_i32 : i32
    %1 = arith.extui %0 : i1 to i32
    %c0_i32_0 = arith.constant 0 : i32
    %2 = arith.cmpi ne, %1, %c0_i32_0 : i32
    scf.if %2 {
      %c0_165 = arith.constant 0 : index
      %c0_166 = arith.constant 0 : index
      %282 = vector.load %arg1[%c0_165, %c0_166] : memref<64x32xf32, #tpu.memory_space<vmem>>, vector<64x32xf32>
      %c0_167 = arith.constant 0 : index
      %c0_168 = arith.constant 0 : index
      %283 = vector.load %arg7[%c0_167, %c0_168] : memref<64x32xf32, #tpu.memory_space<vmem>>, vector<64x32xf32>
      tpu.vector_store %arg7[%c0_167, %c0_168], %282 {strides = array<i32>} : memref<64x32xf32, #tpu.memory_space<vmem>>, vector<64x32xf32>,
    } else {
    }
    %c0 = arith.constant 0 : index
    %c0_1 = arith.constant 0 : index
    %c0_2 = arith.constant 0 : index
    %3 = vector.load %arg2[%c0, %c0_1, %c0_2] : memref<1x8x32xf32, #tpu.memory_space<vmem>>, vector<1x8x32xf32>
    %4 = vector.shape_cast %3 : vector<1x8x32xf32> to vector<8x32xf32>
    %c0_3 = arith.constant 0 : index
    %c0_4 = arith.constant 0 : index
    %5 = vector.load %arg9[%c0_3, %c0_4] : memref<8x32xf32, #tpu.memory_space<vmem>>, vector<8x32xf32>
    tpu.vector_store %arg9[%c0_3, %c0_4], %4 {strides = array<i32>} : memref<8x32xf32, #tpu.memory_space<vmem>>, vector<8x32xf32>,
    %c0_5 = arith.constant 0 : index
    %c0_6 = arith.constant 0 : index
    %c0_7 = arith.constant 0 : index
    %6 = vector.load %arg3[%c0_5, %c0_6, %c0_7] : memref<1x8x32xf32, #tpu.memory_space<vmem>>, vector<1x8x32xf32>
    %7 = vector.shape_cast %6 : vector<1x8x32xf32> to vector<8x32xf32>
    %c0_8 = arith.constant 0 : index
    %c0_9 = arith.constant 0 : index
    %8 = vector.load %arg10[%c0_8, %c0_9] : memref<8x32xf32, #tpu.memory_space<vmem>>, vector<8x32xf32>
    tpu.vector_store %arg10[%c0_8, %c0_9], %7 {strides = array<i32>} : memref<8x32xf32, #tpu.memory_space<vmem>>, vector<8x32xf32>,
    %c0_10 = arith.constant 0 : index
    %c0_11 = arith.constant 0 : index
    %9 = vector.load %arg7[%c0_10, %c0_11] : memref<64x32xf32, #tpu.memory_space<vmem>>, vector<64x32xf32>
    %c0_12 = arith.constant 0 : index
    %c0_13 = arith.constant 0 : index
    %c0_14 = arith.constant 0 : index
    %10 = vector.load %arg4[%c0_12, %c0_13, %c0_14] : memref<1x32x128xf32, #tpu.memory_space<vmem>>, vector<1x32x128xf32>
    %11 = vector.shape_cast %10 : vector<1x32x128xf32> to vector<32x128xf32>
    %cst = arith.constant dense<0.000000e+00> : vector<64x128xf32>
    %12 = tpu.matmul %9, %11, %cst {dimension_numbers = #tpu.dot_dimension_numbers<[1], [0], [0], [1], [0, 0, 1, 1], [], []>} : vector<64x32xf32>, vector<32x128xf32>, vector<64x128xf32> -> vector<64x128xf32>
    %c0_15 = arith.constant 0 : index
    %c0_16 = arith.constant 0 : index
    %c0_17 = arith.constant 0 : index
    %13 = vector.load %arg6[%c0_15, %c0_16, %c0_17] : memref<1x1x128xf32, #tpu.memory_space<vmem>>, vector<1x1x128xf32>
    %14 = vector.shape_cast %13 : vector<1x1x128xf32> to vector<1x128xf32>
    %15 = vector.broadcast %14 : vector<1x128xf32> to vector<64x128xf32>
    %16 = arith.addf %12, %15 : vector<64x128xf32>
    %c0_18 = arith.constant 0 : index
    %c0_19 = arith.constant 0 : index
    %17 = vector.load %arg8[%c0_18, %c0_19] : memref<64x128xf32, #tpu.memory_space<vmem>>, vector<64x128xf32>
    tpu.vector_store %arg8[%c0_18, %c0_19], %16 {strides = array<i32>} : memref<64x128xf32, #tpu.memory_space<vmem>>, vector<64x128xf32>,
    %c0_i32_20 = arith.constant 0 : i32
    %c8_i32 = arith.constant 8 : i32
    %18 = arith.muli %c0_i32_20, %c8_i32 : i32
    %19 = tpu.assume_multiple %18, 8 : i32
    %c8_i32_21 = arith.constant 8 : i32
    %20 = arith.muli %c0_i32_20, %c8_i32_21 : i32
    %c0_i32_22 = arith.constant 0 : i32
    %21 = arith.addi %c0_i32_22, %20 : i32
    %22 = tpu.assume_multiple %21, 8 : i32
    %23 = arith.index_cast %19 : i32 to index
    %c0_23 = arith.constant 0 : index
    %24 = vector.load %arg8[%23, %c0_23] : memref<64x128xf32, #tpu.memory_space<vmem>>, vector<8x128xf32>
    %c0_24 = arith.constant 0 : index
    %c0_25 = arith.constant 0 : index
    %25 = vector.load %arg9[%c0_24, %c0_25] : memref<8x32xf32, #tpu.memory_space<vmem>>, vector<8x32xf32>
    %c0_26 = arith.constant 0 : index
    %c0_27 = arith.constant 0 : index
    %c0_28 = arith.constant 0 : index
    %26 = vector.load %arg5[%c0_26, %c0_27, %c0_28] : memref<1x32x128xf32, #tpu.memory_space<vmem>>, vector<1x32x128xf32>
    %27 = vector.shape_cast %26 : vector<1x32x128xf32> to vector<32x128xf32>
    %cst_29 = arith.constant dense<0.000000e+00> : vector<8x128xf32>
    %28 = tpu.matmul %25, %27, %cst_29 {dimension_numbers = #tpu.dot_dimension_numbers<[1], [0], [0], [1], [0, 0, 1, 1], [], []>} : vector<8x32xf32>, vector<32x128xf32>, vector<8x128xf32> -> vector<8x128xf32>
    %29 = arith.addf %24, %28 : vector<8x128xf32>
    %30 = vector.extract_strided_slice %29 {offsets = [0, 0], sizes = [8, 96], strides = [1, 1]} : vector<8x128xf32> to vector<8x96xf32>
    %31 = arith.negf %30 : vector<8x96xf32>
    %32 = math.exp %31 : vector<8x96xf32>
    %cst_30 = arith.constant 1.000000e+00 : f32
    %33 = vector.broadcast %cst_30 : f32 to vector<8x96xf32>
    %34 = arith.addf %33, %32 : vector<8x96xf32>
    %35 = arith.divf %33, %34 : vector<8x96xf32>
    %36 = vector.extract_strided_slice %29 {offsets = [0, 96], sizes = [8, 32], strides = [1, 1]} : vector<8x128xf32> to vector<8x32xf32>
    %37 = math.tanh %36 : vector<8x32xf32>
    %38 = vector.extract_strided_slice %35 {offsets = [0, 0], sizes = [8, 32], strides = [1, 1]} : vector<8x96xf32> to vector<8x32xf32>
    %39 = vector.extract_strided_slice %35 {offsets = [0, 32], sizes = [8, 32], strides = [1, 1]} : vector<8x96xf32> to vector<8x32xf32>
    %40 = vector.extract_strided_slice %35 {offsets = [0, 64], sizes = [8, 32], strides = [1, 1]} : vector<8x96xf32> to vector<8x32xf32>
    %c0_31 = arith.constant 0 : index
    %c0_32 = arith.constant 0 : index
    %41 = vector.load %arg10[%c0_31, %c0_32] : memref<8x32xf32, #tpu.memory_space<vmem>>, vector<8x32xf32>
    %42 = arith.mulf %39, %41 : vector<8x32xf32>
    %43 = arith.mulf %38, %37 : vector<8x32xf32>
    %44 = arith.addf %42, %43 : vector<8x32xf32>
    %45 = math.tanh %44 : vector<8x32xf32>
    %46 = arith.mulf %40, %45 : vector<8x32xf32>
    %c0_33 = arith.constant 0 : index
    %c0_34 = arith.constant 0 : index
    %47 = vector.load %arg10[%c0_33, %c0_34] : memref<8x32xf32, #tpu.memory_space<vmem>>, vector<8x32xf32>
    tpu.vector_store %arg10[%c0_33, %c0_34], %44 {strides = array<i32>} : memref<8x32xf32, #tpu.memory_space<vmem>>, vector<8x32xf32>,
    %c0_35 = arith.constant 0 : index
    %c0_36 = arith.constant 0 : index
    %48 = vector.load %arg9[%c0_35, %c0_36] : memref<8x32xf32, #tpu.memory_space<vmem>>, vector<8x32xf32>
    tpu.vector_store %arg9[%c0_35, %c0_36], %46 {strides = array<i32>} : memref<8x32xf32, #tpu.memory_space<vmem>>, vector<8x32xf32>,
    %49 = arith.index_cast %22 : i32 to index
    %c0_37 = arith.constant 0 : index
    %50 = vector.load %arg7[%49, %c0_37] : memref<64x32xf32, #tpu.memory_space<vmem>>, vector<8x32xf32>
    tpu.vector_store %arg7[%49, %c0_37], %46 {strides = array<i32>} : memref<64x32xf32, #tpu.memory_space<vmem>>, vector<8x32xf32>,
    %c1_i32 = arith.constant 1 : i32
    %c8_i32_38 = arith.constant 8 : i32
    %51 = arith.muli %c1_i32, %c8_i32_38 : i32
    %52 = tpu.assume_multiple %51, 8 : i32
    %c8_i32_39 = arith.constant 8 : i32
    %53 = arith.muli %c1_i32, %c8_i32_39 : i32
    %c0_i32_40 = arith.constant 0 : i32
    %54 = arith.addi %c0_i32_40, %53 : i32
    %55 = tpu.assume_multiple %54, 8 : i32
    %56 = arith.index_cast %52 : i32 to index
    %c0_41 = arith.constant 0 : index
    %57 = vector.load %arg8[%56, %c0_41] : memref<64x128xf32, #tpu.memory_space<vmem>>, vector<8x128xf32>
    %c0_42 = arith.constant 0 : index
    %c0_43 = arith.constant 0 : index
    %58 = vector.load %arg9[%c0_42, %c0_43] : memref<8x32xf32, #tpu.memory_space<vmem>>, vector<8x32xf32>
    %c0_44 = arith.constant 0 : index
    %c0_45 = arith.constant 0 : index
    %c0_46 = arith.constant 0 : index
    %59 = vector.load %arg5[%c0_44, %c0_45, %c0_46] : memref<1x32x128xf32, #tpu.memory_space<vmem>>, vector<1x32x128xf32>
    %60 = vector.shape_cast %59 : vector<1x32x128xf32> to vector<32x128xf32>
    %cst_47 = arith.constant dense<0.000000e+00> : vector<8x128xf32>
    %61 = tpu.matmul %58, %60, %cst_47 {dimension_numbers = #tpu.dot_dimension_numbers<[1], [0], [0], [1], [0, 0, 1, 1], [], []>} : vector<8x32xf32>, vector<32x128xf32>, vector<8x128xf32> -> vector<8x128xf32>
    %62 = arith.addf %57, %61 : vector<8x128xf32>
    %63 = vector.extract_strided_slice %62 {offsets = [0, 0], sizes = [8, 96], strides = [1, 1]} : vector<8x128xf32> to vector<8x96xf32>
    %64 = arith.negf %63 : vector<8x96xf32>
    %65 = math.exp %64 : vector<8x96xf32>
    %cst_48 = arith.constant 1.000000e+00 : f32
    %66 = vector.broadcast %cst_48 : f32 to vector<8x96xf32>
    %67 = arith.addf %66, %65 : vector<8x96xf32>
    %68 = arith.divf %66, %67 : vector<8x96xf32>
    %69 = vector.extract_strided_slice %62 {offsets = [0, 96], sizes = [8, 32], strides = [1, 1]} : vector<8x128xf32> to vector<8x32xf32>
    %70 = math.tanh %69 : vector<8x32xf32>
    %71 = vector.extract_strided_slice %68 {offsets = [0, 0], sizes = [8, 32], strides = [1, 1]} : vector<8x96xf32> to vector<8x32xf32>
    %72 = vector.extract_strided_slice %68 {offsets = [0, 32], sizes = [8, 32], strides = [1, 1]} : vector<8x96xf32> to vector<8x32xf32>
    %73 = vector.extract_strided_slice %68 {offsets = [0, 64], sizes = [8, 32], strides = [1, 1]} : vector<8x96xf32> to vector<8x32xf32>
    %c0_49 = arith.constant 0 : index
    %c0_50 = arith.constant 0 : index
    %74 = vector.load %arg10[%c0_49, %c0_50] : memref<8x32xf32, #tpu.memory_space<vmem>>, vector<8x32xf32>
    %75 = arith.mulf %72, %74 : vector<8x32xf32>
    %76 = arith.mulf %71, %70 : vector<8x32xf32>
    %77 = arith.addf %75, %76 : vector<8x32xf32>
    %78 = math.tanh %77 : vector<8x32xf32>
    %79 = arith.mulf %73, %78 : vector<8x32xf32>
    %c0_51 = arith.constant 0 : index
    %c0_52 = arith.constant 0 : index
    %80 = vector.load %arg10[%c0_51, %c0_52] : memref<8x32xf32, #tpu.memory_space<vmem>>, vector<8x32xf32>
    tpu.vector_store %arg10[%c0_51, %c0_52], %77 {strides = array<i32>} : memref<8x32xf32, #tpu.memory_space<vmem>>, vector<8x32xf32>,
    %c0_53 = arith.constant 0 : index
    %c0_54 = arith.constant 0 : index
    %81 = vector.load %arg9[%c0_53, %c0_54] : memref<8x32xf32, #tpu.memory_space<vmem>>, vector<8x32xf32>
    tpu.vector_store %arg9[%c0_53, %c0_54], %79 {strides = array<i32>} : memref<8x32xf32, #tpu.memory_space<vmem>>, vector<8x32xf32>,
    %82 = arith.index_cast %55 : i32 to index
    %c0_55 = arith.constant 0 : index
    %83 = vector.load %arg7[%82, %c0_55] : memref<64x32xf32, #tpu.memory_space<vmem>>, vector<8x32xf32>
    tpu.vector_store %arg7[%82, %c0_55], %79 {strides = array<i32>} : memref<64x32xf32, #tpu.memory_space<vmem>>, vector<8x32xf32>,
    %c2_i32 = arith.constant 2 : i32
    %c8_i32_56 = arith.constant 8 : i32
    %84 = arith.muli %c2_i32, %c8_i32_56 : i32
    %85 = tpu.assume_multiple %84, 8 : i32
    %c8_i32_57 = arith.constant 8 : i32
    %86 = arith.muli %c2_i32, %c8_i32_57 : i32
    %c0_i32_58 = arith.constant 0 : i32
    %87 = arith.addi %c0_i32_58, %86 : i32
    %88 = tpu.assume_multiple %87, 8 : i32
    %89 = arith.index_cast %85 : i32 to index
    %c0_59 = arith.constant 0 : index
    %90 = vector.load %arg8[%89, %c0_59] : memref<64x128xf32, #tpu.memory_space<vmem>>, vector<8x128xf32>
    %c0_60 = arith.constant 0 : index
    %c0_61 = arith.constant 0 : index
    %91 = vector.load %arg9[%c0_60, %c0_61] : memref<8x32xf32, #tpu.memory_space<vmem>>, vector<8x32xf32>
    %c0_62 = arith.constant 0 : index
    %c0_63 = arith.constant 0 : index
    %c0_64 = arith.constant 0 : index
    %92 = vector.load %arg5[%c0_62, %c0_63, %c0_64] : memref<1x32x128xf32, #tpu.memory_space<vmem>>, vector<1x32x128xf32>
    %93 = vector.shape_cast %92 : vector<1x32x128xf32> to vector<32x128xf32>
    %cst_65 = arith.constant dense<0.000000e+00> : vector<8x128xf32>
    %94 = tpu.matmul %91, %93, %cst_65 {dimension_numbers = #tpu.dot_dimension_numbers<[1], [0], [0], [1], [0, 0, 1, 1], [], []>} : vector<8x32xf32>, vector<32x128xf32>, vector<8x128xf32> -> vector<8x128xf32>
    %95 = arith.addf %90, %94 : vector<8x128xf32>
    %96 = vector.extract_strided_slice %95 {offsets = [0, 0], sizes = [8, 96], strides = [1, 1]} : vector<8x128xf32> to vector<8x96xf32>
    %97 = arith.negf %96 : vector<8x96xf32>
    %98 = math.exp %97 : vector<8x96xf32>
    %cst_66 = arith.constant 1.000000e+00 : f32
    %99 = vector.broadcast %cst_66 : f32 to vector<8x96xf32>
    %100 = arith.addf %99, %98 : vector<8x96xf32>
    %101 = arith.divf %99, %100 : vector<8x96xf32>
    %102 = vector.extract_strided_slice %95 {offsets = [0, 96], sizes = [8, 32], strides = [1, 1]} : vector<8x128xf32> to vector<8x32xf32>
    %103 = math.tanh %102 : vector<8x32xf32>
    %104 = vector.extract_strided_slice %101 {offsets = [0, 0], sizes = [8, 32], strides = [1, 1]} : vector<8x96xf32> to vector<8x32xf32>
    %105 = vector.extract_strided_slice %101 {offsets = [0, 32], sizes = [8, 32], strides = [1, 1]} : vector<8x96xf32> to vector<8x32xf32>
    %106 = vector.extract_strided_slice %101 {offsets = [0, 64], sizes = [8, 32], strides = [1, 1]} : vector<8x96xf32> to vector<8x32xf32>
    %c0_67 = arith.constant 0 : index
    %c0_68 = arith.constant 0 : index
    %107 = vector.load %arg10[%c0_67, %c0_68] : memref<8x32xf32, #tpu.memory_space<vmem>>, vector<8x32xf32>
    %108 = arith.mulf %105, %107 : vector<8x32xf32>
    %109 = arith.mulf %104, %103 : vector<8x32xf32>
    %110 = arith.addf %108, %109 : vector<8x32xf32>
    %111 = math.tanh %110 : vector<8x32xf32>
    %112 = arith.mulf %106, %111 : vector<8x32xf32>
    %c0_69 = arith.constant 0 : index
    %c0_70 = arith.constant 0 : index
    %113 = vector.load %arg10[%c0_69, %c0_70] : memref<8x32xf32, #tpu.memory_space<vmem>>, vector<8x32xf32>
    tpu.vector_store %arg10[%c0_69, %c0_70], %110 {strides = array<i32>} : memref<8x32xf32, #tpu.memory_space<vmem>>, vector<8x32xf32>,
    %c0_71 = arith.constant 0 : index
    %c0_72 = arith.constant 0 : index
    %114 = vector.load %arg9[%c0_71, %c0_72] : memref<8x32xf32, #tpu.memory_space<vmem>>, vector<8x32xf32>
    tpu.vector_store %arg9[%c0_71, %c0_72], %112 {strides = array<i32>} : memref<8x32xf32, #tpu.memory_space<vmem>>, vector<8x32xf32>,
    %115 = arith.index_cast %88 : i32 to index
    %c0_73 = arith.constant 0 : index
    %116 = vector.load %arg7[%115, %c0_73] : memref<64x32xf32, #tpu.memory_space<vmem>>, vector<8x32xf32>
    tpu.vector_store %arg7[%115, %c0_73], %112 {strides = array<i32>} : memref<64x32xf32, #tpu.memory_space<vmem>>, vector<8x32xf32>,
    %c3_i32 = arith.constant 3 : i32
    %c8_i32_74 = arith.constant 8 : i32
    %117 = arith.muli %c3_i32, %c8_i32_74 : i32
    %118 = tpu.assume_multiple %117, 8 : i32
    %c8_i32_75 = arith.constant 8 : i32
    %119 = arith.muli %c3_i32, %c8_i32_75 : i32
    %c0_i32_76 = arith.constant 0 : i32
    %120 = arith.addi %c0_i32_76, %119 : i32
    %121 = tpu.assume_multiple %120, 8 : i32
    %122 = arith.index_cast %118 : i32 to index
    %c0_77 = arith.constant 0 : index
    %123 = vector.load %arg8[%122, %c0_77] : memref<64x128xf32, #tpu.memory_space<vmem>>, vector<8x128xf32>
    %c0_78 = arith.constant 0 : index
    %c0_79 = arith.constant 0 : index
    %124 = vector.load %arg9[%c0_78, %c0_79] : memref<8x32xf32, #tpu.memory_space<vmem>>, vector<8x32xf32>
    %c0_80 = arith.constant 0 : index
    %c0_81 = arith.constant 0 : index
    %c0_82 = arith.constant 0 : index
    %125 = vector.load %arg5[%c0_80, %c0_81, %c0_82] : memref<1x32x128xf32, #tpu.memory_space<vmem>>, vector<1x32x128xf32>
    %126 = vector.shape_cast %125 : vector<1x32x128xf32> to vector<32x128xf32>
    %cst_83 = arith.constant dense<0.000000e+00> : vector<8x128xf32>
    %127 = tpu.matmul %124, %126, %cst_83 {dimension_numbers = #tpu.dot_dimension_numbers<[1], [0], [0], [1], [0, 0, 1, 1], [], []>} : vector<8x32xf32>, vector<32x128xf32>, vector<8x128xf32> -> vector<8x128xf32>
    %128 = arith.addf %123, %127 : vector<8x128xf32>
    %129 = vector.extract_strided_slice %128 {offsets = [0, 0], sizes = [8, 96], strides = [1, 1]} : vector<8x128xf32> to vector<8x96xf32>
    %130 = arith.negf %129 : vector<8x96xf32>
    %131 = math.exp %130 : vector<8x96xf32>
    %cst_84 = arith.constant 1.000000e+00 : f32
    %132 = vector.broadcast %cst_84 : f32 to vector<8x96xf32>
    %133 = arith.addf %132, %131 : vector<8x96xf32>
    %134 = arith.divf %132, %133 : vector<8x96xf32>
    %135 = vector.extract_strided_slice %128 {offsets = [0, 96], sizes = [8, 32], strides = [1, 1]} : vector<8x128xf32> to vector<8x32xf32>
    %136 = math.tanh %135 : vector<8x32xf32>
    %137 = vector.extract_strided_slice %134 {offsets = [0, 0], sizes = [8, 32], strides = [1, 1]} : vector<8x96xf32> to vector<8x32xf32>
    %138 = vector.extract_strided_slice %134 {offsets = [0, 32], sizes = [8, 32], strides = [1, 1]} : vector<8x96xf32> to vector<8x32xf32>
    %139 = vector.extract_strided_slice %134 {offsets = [0, 64], sizes = [8, 32], strides = [1, 1]} : vector<8x96xf32> to vector<8x32xf32>
    %c0_85 = arith.constant 0 : index
    %c0_86 = arith.constant 0 : index
    %140 = vector.load %arg10[%c0_85, %c0_86] : memref<8x32xf32, #tpu.memory_space<vmem>>, vector<8x32xf32>
    %141 = arith.mulf %138, %140 : vector<8x32xf32>
    %142 = arith.mulf %137, %136 : vector<8x32xf32>
    %143 = arith.addf %141, %142 : vector<8x32xf32>
    %144 = math.tanh %143 : vector<8x32xf32>
    %145 = arith.mulf %139, %144 : vector<8x32xf32>
    %c0_87 = arith.constant 0 : index
    %c0_88 = arith.constant 0 : index
    %146 = vector.load %arg10[%c0_87, %c0_88] : memref<8x32xf32, #tpu.memory_space<vmem>>, vector<8x32xf32>
    tpu.vector_store %arg10[%c0_87, %c0_88], %143 {strides = array<i32>} : memref<8x32xf32, #tpu.memory_space<vmem>>, vector<8x32xf32>,
    %c0_89 = arith.constant 0 : index
    %c0_90 = arith.constant 0 : index
    %147 = vector.load %arg9[%c0_89, %c0_90] : memref<8x32xf32, #tpu.memory_space<vmem>>, vector<8x32xf32>
    tpu.vector_store %arg9[%c0_89, %c0_90], %145 {strides = array<i32>} : memref<8x32xf32, #tpu.memory_space<vmem>>, vector<8x32xf32>,
    %148 = arith.index_cast %121 : i32 to index
    %c0_91 = arith.constant 0 : index
    %149 = vector.load %arg7[%148, %c0_91] : memref<64x32xf32, #tpu.memory_space<vmem>>, vector<8x32xf32>
    tpu.vector_store %arg7[%148, %c0_91], %145 {strides = array<i32>} : memref<64x32xf32, #tpu.memory_space<vmem>>, vector<8x32xf32>,
    %c4_i32 = arith.constant 4 : i32
    %c8_i32_92 = arith.constant 8 : i32
    %150 = arith.muli %c4_i32, %c8_i32_92 : i32
    %151 = tpu.assume_multiple %150, 8 : i32
    %c8_i32_93 = arith.constant 8 : i32
    %152 = arith.muli %c4_i32, %c8_i32_93 : i32
    %c0_i32_94 = arith.constant 0 : i32
    %153 = arith.addi %c0_i32_94, %152 : i32
    %154 = tpu.assume_multiple %153, 8 : i32
    %155 = arith.index_cast %151 : i32 to index
    %c0_95 = arith.constant 0 : index
    %156 = vector.load %arg8[%155, %c0_95] : memref<64x128xf32, #tpu.memory_space<vmem>>, vector<8x128xf32>
    %c0_96 = arith.constant 0 : index
    %c0_97 = arith.constant 0 : index
    %157 = vector.load %arg9[%c0_96, %c0_97] : memref<8x32xf32, #tpu.memory_space<vmem>>, vector<8x32xf32>
    %c0_98 = arith.constant 0 : index
    %c0_99 = arith.constant 0 : index
    %c0_100 = arith.constant 0 : index
    %158 = vector.load %arg5[%c0_98, %c0_99, %c0_100] : memref<1x32x128xf32, #tpu.memory_space<vmem>>, vector<1x32x128xf32>
    %159 = vector.shape_cast %158 : vector<1x32x128xf32> to vector<32x128xf32>
    %cst_101 = arith.constant dense<0.000000e+00> : vector<8x128xf32>
    %160 = tpu.matmul %157, %159, %cst_101 {dimension_numbers = #tpu.dot_dimension_numbers<[1], [0], [0], [1], [0, 0, 1, 1], [], []>} : vector<8x32xf32>, vector<32x128xf32>, vector<8x128xf32> -> vector<8x128xf32>
    %161 = arith.addf %156, %160 : vector<8x128xf32>
    %162 = vector.extract_strided_slice %161 {offsets = [0, 0], sizes = [8, 96], strides = [1, 1]} : vector<8x128xf32> to vector<8x96xf32>
    %163 = arith.negf %162 : vector<8x96xf32>
    %164 = math.exp %163 : vector<8x96xf32>
    %cst_102 = arith.constant 1.000000e+00 : f32
    %165 = vector.broadcast %cst_102 : f32 to vector<8x96xf32>
    %166 = arith.addf %165, %164 : vector<8x96xf32>
    %167 = arith.divf %165, %166 : vector<8x96xf32>
    %168 = vector.extract_strided_slice %161 {offsets = [0, 96], sizes = [8, 32], strides = [1, 1]} : vector<8x128xf32> to vector<8x32xf32>
    %169 = math.tanh %168 : vector<8x32xf32>
    %170 = vector.extract_strided_slice %167 {offsets = [0, 0], sizes = [8, 32], strides = [1, 1]} : vector<8x96xf32> to vector<8x32xf32>
    %171 = vector.extract_strided_slice %167 {offsets = [0, 32], sizes = [8, 32], strides = [1, 1]} : vector<8x96xf32> to vector<8x32xf32>
    %172 = vector.extract_strided_slice %167 {offsets = [0, 64], sizes = [8, 32], strides = [1, 1]} : vector<8x96xf32> to vector<8x32xf32>
    %c0_103 = arith.constant 0 : index
    %c0_104 = arith.constant 0 : index
    %173 = vector.load %arg10[%c0_103, %c0_104] : memref<8x32xf32, #tpu.memory_space<vmem>>, vector<8x32xf32>
    %174 = arith.mulf %171, %173 : vector<8x32xf32>
    %175 = arith.mulf %170, %169 : vector<8x32xf32>
    %176 = arith.addf %174, %175 : vector<8x32xf32>
    %177 = math.tanh %176 : vector<8x32xf32>
    %178 = arith.mulf %172, %177 : vector<8x32xf32>
    %c0_105 = arith.constant 0 : index
    %c0_106 = arith.constant 0 : index
    %179 = vector.load %arg10[%c0_105, %c0_106] : memref<8x32xf32, #tpu.memory_space<vmem>>, vector<8x32xf32>
    tpu.vector_store %arg10[%c0_105, %c0_106], %176 {strides = array<i32>} : memref<8x32xf32, #tpu.memory_space<vmem>>, vector<8x32xf32>,
    %c0_107 = arith.constant 0 : index
    %c0_108 = arith.constant 0 : index
    %180 = vector.load %arg9[%c0_107, %c0_108] : memref<8x32xf32, #tpu.memory_space<vmem>>, vector<8x32xf32>
    tpu.vector_store %arg9[%c0_107, %c0_108], %178 {strides = array<i32>} : memref<8x32xf32, #tpu.memory_space<vmem>>, vector<8x32xf32>,
    %181 = arith.index_cast %154 : i32 to index
    %c0_109 = arith.constant 0 : index
    %182 = vector.load %arg7[%181, %c0_109] : memref<64x32xf32, #tpu.memory_space<vmem>>, vector<8x32xf32>
    tpu.vector_store %arg7[%181, %c0_109], %178 {strides = array<i32>} : memref<64x32xf32, #tpu.memory_space<vmem>>, vector<8x32xf32>,
    %c5_i32 = arith.constant 5 : i32
    %c8_i32_110 = arith.constant 8 : i32
    %183 = arith.muli %c5_i32, %c8_i32_110 : i32
    %184 = tpu.assume_multiple %183, 8 : i32
    %c8_i32_111 = arith.constant 8 : i32
    %185 = arith.muli %c5_i32, %c8_i32_111 : i32
    %c0_i32_112 = arith.constant 0 : i32
    %186 = arith.addi %c0_i32_112, %185 : i32
    %187 = tpu.assume_multiple %186, 8 : i32
    %188 = arith.index_cast %184 : i32 to index
    %c0_113 = arith.constant 0 : index
    %189 = vector.load %arg8[%188, %c0_113] : memref<64x128xf32, #tpu.memory_space<vmem>>, vector<8x128xf32>
    %c0_114 = arith.constant 0 : index
    %c0_115 = arith.constant 0 : index
    %190 = vector.load %arg9[%c0_114, %c0_115] : memref<8x32xf32, #tpu.memory_space<vmem>>, vector<8x32xf32>
    %c0_116 = arith.constant 0 : index
    %c0_117 = arith.constant 0 : index
    %c0_118 = arith.constant 0 : index
    %191 = vector.load %arg5[%c0_116, %c0_117, %c0_118] : memref<1x32x128xf32, #tpu.memory_space<vmem>>, vector<1x32x128xf32>
    %192 = vector.shape_cast %191 : vector<1x32x128xf32> to vector<32x128xf32>
    %cst_119 = arith.constant dense<0.000000e+00> : vector<8x128xf32>
    %193 = tpu.matmul %190, %192, %cst_119 {dimension_numbers = #tpu.dot_dimension_numbers<[1], [0], [0], [1], [0, 0, 1, 1], [], []>} : vector<8x32xf32>, vector<32x128xf32>, vector<8x128xf32> -> vector<8x128xf32>
    %194 = arith.addf %189, %193 : vector<8x128xf32>
    %195 = vector.extract_strided_slice %194 {offsets = [0, 0], sizes = [8, 96], strides = [1, 1]} : vector<8x128xf32> to vector<8x96xf32>
    %196 = arith.negf %195 : vector<8x96xf32>
    %197 = math.exp %196 : vector<8x96xf32>
    %cst_120 = arith.constant 1.000000e+00 : f32
    %198 = vector.broadcast %cst_120 : f32 to vector<8x96xf32>
    %199 = arith.addf %198, %197 : vector<8x96xf32>
    %200 = arith.divf %198, %199 : vector<8x96xf32>
    %201 = vector.extract_strided_slice %194 {offsets = [0, 96], sizes = [8, 32], strides = [1, 1]} : vector<8x128xf32> to vector<8x32xf32>
    %202 = math.tanh %201 : vector<8x32xf32>
    %203 = vector.extract_strided_slice %200 {offsets = [0, 0], sizes = [8, 32], strides = [1, 1]} : vector<8x96xf32> to vector<8x32xf32>
    %204 = vector.extract_strided_slice %200 {offsets = [0, 32], sizes = [8, 32], strides = [1, 1]} : vector<8x96xf32> to vector<8x32xf32>
    %205 = vector.extract_strided_slice %200 {offsets = [0, 64], sizes = [8, 32], strides = [1, 1]} : vector<8x96xf32> to vector<8x32xf32>
    %c0_121 = arith.constant 0 : index
    %c0_122 = arith.constant 0 : index
    %206 = vector.load %arg10[%c0_121, %c0_122] : memref<8x32xf32, #tpu.memory_space<vmem>>, vector<8x32xf32>
    %207 = arith.mulf %204, %206 : vector<8x32xf32>
    %208 = arith.mulf %203, %202 : vector<8x32xf32>
    %209 = arith.addf %207, %208 : vector<8x32xf32>
    %210 = math.tanh %209 : vector<8x32xf32>
    %211 = arith.mulf %205, %210 : vector<8x32xf32>
    %c0_123 = arith.constant 0 : index
    %c0_124 = arith.constant 0 : index
    %212 = vector.load %arg10[%c0_123, %c0_124] : memref<8x32xf32, #tpu.memory_space<vmem>>, vector<8x32xf32>
    tpu.vector_store %arg10[%c0_123, %c0_124], %209 {strides = array<i32>} : memref<8x32xf32, #tpu.memory_space<vmem>>, vector<8x32xf32>,
    %c0_125 = arith.constant 0 : index
    %c0_126 = arith.constant 0 : index
    %213 = vector.load %arg9[%c0_125, %c0_126] : memref<8x32xf32, #tpu.memory_space<vmem>>, vector<8x32xf32>
    tpu.vector_store %arg9[%c0_125, %c0_126], %211 {strides = array<i32>} : memref<8x32xf32, #tpu.memory_space<vmem>>, vector<8x32xf32>,
    %214 = arith.index_cast %187 : i32 to index
    %c0_127 = arith.constant 0 : index
    %215 = vector.load %arg7[%214, %c0_127] : memref<64x32xf32, #tpu.memory_space<vmem>>, vector<8x32xf32>
    tpu.vector_store %arg7[%214, %c0_127], %211 {strides = array<i32>} : memref<64x32xf32, #tpu.memory_space<vmem>>, vector<8x32xf32>,
    %c6_i32 = arith.constant 6 : i32
    %c8_i32_128 = arith.constant 8 : i32
    %216 = arith.muli %c6_i32, %c8_i32_128 : i32
    %217 = tpu.assume_multiple %216, 8 : i32
    %c8_i32_129 = arith.constant 8 : i32
    %218 = arith.muli %c6_i32, %c8_i32_129 : i32
    %c0_i32_130 = arith.constant 0 : i32
    %219 = arith.addi %c0_i32_130, %218 : i32
    %220 = tpu.assume_multiple %219, 8 : i32
    %221 = arith.index_cast %217 : i32 to index
    %c0_131 = arith.constant 0 : index
    %222 = vector.load %arg8[%221, %c0_131] : memref<64x128xf32, #tpu.memory_space<vmem>>, vector<8x128xf32>
    %c0_132 = arith.constant 0 : index
    %c0_133 = arith.constant 0 : index
    %223 = vector.load %arg9[%c0_132, %c0_133] : memref<8x32xf32, #tpu.memory_space<vmem>>, vector<8x32xf32>
    %c0_134 = arith.constant 0 : index
    %c0_135 = arith.constant 0 : index
    %c0_136 = arith.constant 0 : index
    %224 = vector.load %arg5[%c0_134, %c0_135, %c0_136] : memref<1x32x128xf32, #tpu.memory_space<vmem>>, vector<1x32x128xf32>
    %225 = vector.shape_cast %224 : vector<1x32x128xf32> to vector<32x128xf32>
    %cst_137 = arith.constant dense<0.000000e+00> : vector<8x128xf32>
    %226 = tpu.matmul %223, %225, %cst_137 {dimension_numbers = #tpu.dot_dimension_numbers<[1], [0], [0], [1], [0, 0, 1, 1], [], []>} : vector<8x32xf32>, vector<32x128xf32>, vector<8x128xf32> -> vector<8x128xf32>
    %227 = arith.addf %222, %226 : vector<8x128xf32>
    %228 = vector.extract_strided_slice %227 {offsets = [0, 0], sizes = [8, 96], strides = [1, 1]} : vector<8x128xf32> to vector<8x96xf32>
    %229 = arith.negf %228 : vector<8x96xf32>
    %230 = math.exp %229 : vector<8x96xf32>
    %cst_138 = arith.constant 1.000000e+00 : f32
    %231 = vector.broadcast %cst_138 : f32 to vector<8x96xf32>
    %232 = arith.addf %231, %230 : vector<8x96xf32>
    %233 = arith.divf %231, %232 : vector<8x96xf32>
    %234 = vector.extract_strided_slice %227 {offsets = [0, 96], sizes = [8, 32], strides = [1, 1]} : vector<8x128xf32> to vector<8x32xf32>
    %235 = math.tanh %234 : vector<8x32xf32>
    %236 = vector.extract_strided_slice %233 {offsets = [0, 0], sizes = [8, 32], strides = [1, 1]} : vector<8x96xf32> to vector<8x32xf32>
    %237 = vector.extract_strided_slice %233 {offsets = [0, 32], sizes = [8, 32], strides = [1, 1]} : vector<8x96xf32> to vector<8x32xf32>
    %238 = vector.extract_strided_slice %233 {offsets = [0, 64], sizes = [8, 32], strides = [1, 1]} : vector<8x96xf32> to vector<8x32xf32>
    %c0_139 = arith.constant 0 : index
    %c0_140 = arith.constant 0 : index
    %239 = vector.load %arg10[%c0_139, %c0_140] : memref<8x32xf32, #tpu.memory_space<vmem>>, vector<8x32xf32>
    %240 = arith.mulf %237, %239 : vector<8x32xf32>
    %241 = arith.mulf %236, %235 : vector<8x32xf32>
    %242 = arith.addf %240, %241 : vector<8x32xf32>
    %243 = math.tanh %242 : vector<8x32xf32>
    %244 = arith.mulf %238, %243 : vector<8x32xf32>
    %c0_141 = arith.constant 0 : index
    %c0_142 = arith.constant 0 : index
    %245 = vector.load %arg10[%c0_141, %c0_142] : memref<8x32xf32, #tpu.memory_space<vmem>>, vector<8x32xf32>
    tpu.vector_store %arg10[%c0_141, %c0_142], %242 {strides = array<i32>} : memref<8x32xf32, #tpu.memory_space<vmem>>, vector<8x32xf32>,
    %c0_143 = arith.constant 0 : index
    %c0_144 = arith.constant 0 : index
    %246 = vector.load %arg9[%c0_143, %c0_144] : memref<8x32xf32, #tpu.memory_space<vmem>>, vector<8x32xf32>
    tpu.vector_store %arg9[%c0_143, %c0_144], %244 {strides = array<i32>} : memref<8x32xf32, #tpu.memory_space<vmem>>, vector<8x32xf32>,
    %247 = arith.index_cast %220 : i32 to index
    %c0_145 = arith.constant 0 : index
    %248 = vector.load %arg7[%247, %c0_145] : memref<64x32xf32, #tpu.memory_space<vmem>>, vector<8x32xf32>
    tpu.vector_store %arg7[%247, %c0_145], %244 {strides = array<i32>} : memref<64x32xf32, #tpu.memory_space<vmem>>, vector<8x32xf32>,
    %c7_i32 = arith.constant 7 : i32
    %c8_i32_146 = arith.constant 8 : i32
    %249 = arith.muli %c7_i32, %c8_i32_146 : i32
    %250 = tpu.assume_multiple %249, 8 : i32
    %c8_i32_147 = arith.constant 8 : i32
    %251 = arith.muli %c7_i32, %c8_i32_147 : i32
    %c0_i32_148 = arith.constant 0 : i32
    %252 = arith.addi %c0_i32_148, %251 : i32
    %253 = tpu.assume_multiple %252, 8 : i32
    %254 = arith.index_cast %250 : i32 to index
    %c0_149 = arith.constant 0 : index
    %255 = vector.load %arg8[%254, %c0_149] : memref<64x128xf32, #tpu.memory_space<vmem>>, vector<8x128xf32>
    %c0_150 = arith.constant 0 : index
    %c0_151 = arith.constant 0 : index
    %256 = vector.load %arg9[%c0_150, %c0_151] : memref<8x32xf32, #tpu.memory_space<vmem>>, vector<8x32xf32>
    %c0_152 = arith.constant 0 : index
    %c0_153 = arith.constant 0 : index
    %c0_154 = arith.constant 0 : index
    %257 = vector.load %arg5[%c0_152, %c0_153, %c0_154] : memref<1x32x128xf32, #tpu.memory_space<vmem>>, vector<1x32x128xf32>
    %258 = vector.shape_cast %257 : vector<1x32x128xf32> to vector<32x128xf32>
    %cst_155 = arith.constant dense<0.000000e+00> : vector<8x128xf32>
    %259 = tpu.matmul %256, %258, %cst_155 {dimension_numbers = #tpu.dot_dimension_numbers<[1], [0], [0], [1], [0, 0, 1, 1], [], []>} : vector<8x32xf32>, vector<32x128xf32>, vector<8x128xf32> -> vector<8x128xf32>
    %260 = arith.addf %255, %259 : vector<8x128xf32>
    %261 = vector.extract_strided_slice %260 {offsets = [0, 0], sizes = [8, 96], strides = [1, 1]} : vector<8x128xf32> to vector<8x96xf32>
    %262 = arith.negf %261 : vector<8x96xf32>
    %263 = math.exp %262 : vector<8x96xf32>
    %cst_156 = arith.constant 1.000000e+00 : f32
    %264 = vector.broadcast %cst_156 : f32 to vector<8x96xf32>
    %265 = arith.addf %264, %263 : vector<8x96xf32>
    %266 = arith.divf %264, %265 : vector<8x96xf32>
    %267 = vector.extract_strided_slice %260 {offsets = [0, 96], sizes = [8, 32], strides = [1, 1]} : vector<8x128xf32> to vector<8x32xf32>
    %268 = math.tanh %267 : vector<8x32xf32>
    %269 = vector.extract_strided_slice %266 {offsets = [0, 0], sizes = [8, 32], strides = [1, 1]} : vector<8x96xf32> to vector<8x32xf32>
    %270 = vector.extract_strided_slice %266 {offsets = [0, 32], sizes = [8, 32], strides = [1, 1]} : vector<8x96xf32> to vector<8x32xf32>
    %271 = vector.extract_strided_slice %266 {offsets = [0, 64], sizes = [8, 32], strides = [1, 1]} : vector<8x96xf32> to vector<8x32xf32>
    %c0_157 = arith.constant 0 : index
    %c0_158 = arith.constant 0 : index
    %272 = vector.load %arg10[%c0_157, %c0_158] : memref<8x32xf32, #tpu.memory_space<vmem>>, vector<8x32xf32>
    %273 = arith.mulf %270, %272 : vector<8x32xf32>
    %274 = arith.mulf %269, %268 : vector<8x32xf32>
    %275 = arith.addf %273, %274 : vector<8x32xf32>
    %276 = math.tanh %275 : vector<8x32xf32>
    %277 = arith.mulf %271, %276 : vector<8x32xf32>
    %c0_159 = arith.constant 0 : index
    %c0_160 = arith.constant 0 : index
    %278 = vector.load %arg10[%c0_159, %c0_160] : memref<8x32xf32, #tpu.memory_space<vmem>>, vector<8x32xf32>
    tpu.vector_store %arg10[%c0_159, %c0_160], %275 {strides = array<i32>} : memref<8x32xf32, #tpu.memory_space<vmem>>, vector<8x32xf32>,
    %c0_161 = arith.constant 0 : index
    %c0_162 = arith.constant 0 : index
    %279 = vector.load %arg9[%c0_161, %c0_162] : memref<8x32xf32, #tpu.memory_space<vmem>>, vector<8x32xf32>
    tpu.vector_store %arg9[%c0_161, %c0_162], %277 {strides = array<i32>} : memref<8x32xf32, #tpu.memory_space<vmem>>, vector<8x32xf32>,
    %280 = arith.index_cast %253 : i32 to index
    %c0_163 = arith.constant 0 : index
    %281 = vector.load %arg7[%280, %c0_163] : memref<64x32xf32, #tpu.memory_space<vmem>>, vector<8x32xf32>
    tpu.vector_store %arg7[%280, %c0_163], %277 {strides = array<i32>} : memref<64x32xf32, #tpu.memory_space<vmem>>, vector<8x32xf32>,
    %c8_i32_164 = arith.constant 8 : i32
    return
  }
  func.func @transform_0(%arg0: i32) -> (i32, i32) {
    %c0_i32 = arith.constant 0 : i32
    %c0_i32_0 = arith.constant 0 : i32
    %c0_i32_1 = arith.constant 0 : i32
    return %c0_i32, %c0_i32_0 : i32, i32
  }
  func.func @transform_1(%arg0: i32) -> (i32, i32, i32) {
    %c0_i32 = arith.constant 0 : i32
    %c0_i32_0 = arith.constant 0 : i32
    %c0_i32_1 = arith.constant 0 : i32
    return %arg0, %c0_i32, %c0_i32_0 : i32, i32, i32
  }
  func.func @transform_2(%arg0: i32) -> (i32, i32, i32) {
    %c0_i32 = arith.constant 0 : i32
    %c0_i32_0 = arith.constant 0 : i32
    %c0_i32_1 = arith.constant 0 : i32
    return %arg0, %c0_i32, %c0_i32_0 : i32, i32, i32
  }
  func.func @transform_3(%arg0: i32) -> (i32, i32, i32) {
    %c0_i32 = arith.constant 0 : i32
    %c0_i32_0 = arith.constant 0 : i32
    %c0_i32_1 = arith.constant 0 : i32
    return %arg0, %c0_i32, %c0_i32_0 : i32, i32, i32
  }
  func.func @transform_4(%arg0: i32) -> (i32, i32, i32) {
    %c0_i32 = arith.constant 0 : i32
    %c0_i32_0 = arith.constant 0 : i32
    %c0_i32_1 = arith.constant 0 : i32
    return %arg0, %c0_i32, %c0_i32_0 : i32, i32, i32
  }
  func.func @transform_5(%arg0: i32) -> (i32, i32, i32) {
    %c0_i32 = arith.constant 0 : i32
    %c0_i32_0 = arith.constant 0 : i32
    %c0_i32_1 = arith.constant 0 : i32
    return %arg0, %c0_i32, %c0_i32_0 : i32, i32, i32
  }
  func.func @transform_6(%arg0: i32) -> (i32, i32) {
    %c0_i32 = arith.constant 0 : i32
    %c0_i32_0 = arith.constant 0 : i32
    %c0_i32_1 = arith.constant 0 : i32
    return %c0_i32, %c0_i32_0 : i32, i32
  }
}

</mosaic_0001>

<bundles_post_ra>
// kernel: tpu_custom_call.1
= control target key start
LH: loop header
LB: loop body
LE: loop exit
PB: predicated region body
PF: predicated region fallthrough
CT: control target
= control target key end

     0   :  { %11 = vsyncpa [#allocation6], 0  ;;  %s2451_s0 = inlined_call_operand.vmem [shape: f32[64,32], index: 0, kind: input, shape index: {}]   ;;  %s2452_s1 = inlined_call_operand.vmem [shape: f32[2,8,32], index: 1, kind: input, shape index: {}]   ;;  %s2453_s2 = inlined_call_operand.vmem [shape: f32[2,8,32], index: 2, kind: input, shape index: {}]   ;;  %s2454_s3 = inlined_call_operand.vmem [shape: f32[2,32,128], index: 3, kind: input, shape index: {}]   ;;  %s2455_s4 = inlined_call_operand.hbm [shape: f32[2,32,128], index: 4, kind: input, shape index: {}]   ;;  %s2456_s5 = inlined_call_operand.vmem [shape: f32[2,1,128], index: 5, kind: input, shape index: {}]   ;;  %s2457_s6 = inlined_call_operand.vmem [shape: f32[64,32], index: 6, kind: output, shape index: {}]  }
   0x1   :  { %13 = vsyncpa [#allocation6 + $0x1], 0  ;;  %s2051_s21 = smov 0   ;;  %s2053_s22 = smov 0  }
   0x2   :  { %s2055_s23 = smov 0   ;;  %s2057_s24 = smov 0  }
   0x3 LB: > { %s2070_s25 = sadd.s32 4294967295, %s2005_s24   ;;  %s2073_s26 = sadd.s32 1, %s2005_s24   ;;  %s2005_s24 = sphi %s2057_s24, %s2464_s24   ;;  %s2001_s23 = sphi %s2055_s23, %s2463_s23   ;;  %s1997_s22 = sphi %s2053_s22, %s2462_s22   ;;  %s1993_s21 = sphi %s2051_s21, %s2461_s21  }
   0x4   : > { %s122_s27 = ssub.s32 %s2005_s24, %s2073_s26  ;;  %s125_s28 = sadd.s32 1, %s2001_s23 }
   0x5   : > { %p123_p0 = scmp.eq.s32.totalorder %s122_s27, 0  ;;  %p132_p1 = scmp.ne.s32.totalorder %s2001_s23, %s1997_s22 }
   0x6   : > { %p133_p2 = scmp.eq.s32.totalorder %s2005_s24, 0  ;;  %p138_p3 = scmp.ne.s32.totalorder %s1997_s22, %s1993_s21 }
   0x7   : > { %s2083_s29 = scalar_select %p123_p0, %s2001_s23, %s125_s28  }
   0x8   : > { %p134_p4 = por %p133_p2, %p132_p1  ;;  %p139_p5 = scmp.eq.s32.totalorder %s2070_s25, 0 }
   0x9   : > { %p1836_p6 = scmp.lt.s32.totalorder %s2005_s24, 2  ;;  %s234_s7 = sand.u32 1, %s2001_s23  }
   0xa   : > { %p2087_p7 = por %p139_p5, %p138_p3  ;;  %s1568_s8 = sshll.u32 %s234_s7, 5 }
   0xb   : > { %s1612_s9 = sshll.u32 %s2005_s24, 9  ;;  %s238_s13 = scalar_lea.vmem [#allocation5], %s1568_s8 }
   0xc   : > { %s2096_s12 = scalar_lea.hbm %s2455_s4, %s1612_s9  ;;  %s245_s14 = sshll.u32 %s238_s13, 4  ;;  %s2098_s14 = int_to_ptr.vmem [resolvable:$true] %s245_s14 }
   0xd   : > { %p2100_p8 = pnand %p1836_p6, %p134_p4  ;;  %s2105_s16 = scalar_lea.sflag [#allocation6], %s234_s7 }
   0xe   : > { %s1941_s17 = scalar_lea.hbm %s2096_s12, 512  ;;  %s1946_s20 = scalar_lea.hbm %s2455_s4, 1024 }
   0xf   : > { %p1942_p10 = scmp.ne.s32.totalorder %s2096_s12, %s1941_s17  ;;  %p1943_p11 = pneg %p2100_p8 }
  0x10   : > { %p1947_p0 = scmp.lt.u32.totalorder %s2096_s12, %s2455_s4  ;;  %p1948_p1 = scmp.lt.u32.totalorder %s1946_s20, %s1941_s17 }
  0x11   : > { %p1944_p12 = pnand %p1943_p11, %p1942_p10  ;;  %p1950_p3 = scmp.lt.u32.totalorder %s1941_s17, %s2096_s12 }
  0x12   : > { %p1949_p2 = por %p1948_p1, %p1947_p0 }
  0x13   : > { %p1945_p13 = pneg %p1944_p12 }
  0x14   : > { %p1951_p4 = por %p1950_p3, %p1949_p2 }
  0x16   : > { %p1952_p5 = pnand %p1951_p4, %p1945_p13 }
  0x18   : > { %1955 = shalt.err (!%p1952_p5)
}
  0x19   : > { %s1956_s28 = scalar_lea.vmem %s2098_s14, 512  ;;  %s2007_s7 = smov [#allocation5]  }
  0x1a   : > { %p1957_p6 = scmp.ne.s32.totalorder %s2098_s14, %s1956_s28  ;;  %s1961_s8 = sshll.u32 %s2007_s7, 4  ;;  %s1962_s8 = int_to_ptr.vmem [resolvable:$false] %s1961_s8 }
  0x1b   : > { %s1963_s9 = scalar_lea.vmem %s1962_s8, 1024  ;;  %p1964_p9 = scmp.lt.s32.totalorder %s2098_s14, %s1962_s8 }
  0x1c   : > { %p1959_p10 = pnand %p1957_p6, %p1943_p11  ;;  %p1965_p0 = scmp.lt.s32.totalorder %s1963_s9, %s1956_s28 }
  0x1e   : > { %p1960_p12 = pneg %p1959_p10  ;;  %p1966_p1 = por %p1965_p0, %p1964_p9 }
  0x20   : > { %p1967_p2 = pnand %p1966_p1, %p1960_p12 }
  0x22   : > { %1970 = shalt.err (!%p1967_p2)
}
  0x23   : > { %s2008_s10 = smov 128   ;;  %s2009_s11 = smov 8  }
  0x24   : > { %1835 = dma.hbm_to_vmem [thread:$0]  (!%p2100_p8), %s2096_s12, 512, %s2098_s14, %s2105_s16, %s2008_s10, %s2008_s10, %s2009_s11  }
  0x25   : > { %p259_p11 = scmp.lt.s32.totalorder %s2005_s24, 3  ;;  %p2460_p13 = scmp.ge.s32.totalorder %s2005_s24, 1 }
  0x27   : > { %p260_p3 = pnand %p2460_p13, %p259_p11 }
  0x28   : > { %s265_s13 = sand.u32 (!%p260_p3), 1, %s1997_s22  }
  0x29   : > { %263 = sbr.rel (%p260_p3) target bundleno = 5746 (0x1672), region = 44  ;;  %s1572_s17 = sshll.u32 (!%p260_p3), %s265_s13, 5 }
  0x2a   : > { %s266_s18 = scalar_lea.sflag (!%p260_p3), [#allocation6], %s265_s13  ;;  %s2137_s19 = scalar_lea.vmem (!%p260_p3), [#allocation5], %s1572_s17 }
  0x30   : > { %1988 = dma.done.wait (%p2087_p7), %s266_s18, 512  }
  0x31   : > { %1990 = vsyncadd (%p2087_p7), %s266_s18, 4294966784  ;;  %p309_p9 = scmp.lt.s32.totalorder %s2070_s25, 1  ;;  %p1577_p7 = scmp.ne.s32.totalorder %s2070_s25, 0 }
  0x32   : > { %v329_v0 = vld [vmem:[%s2451_s0] sm:$0xff] (!%p1577_p7)  ;;  %vm337_vm0 = vcmask (!%p1577_p7), 261120   ;;  %v330_v1 = vld [vmem:[%s2451_s0 + $0x8] sm:$0xff] (!%p1577_p7)  ;;  %v331_v2 = vld [vmem:[%s2451_s0 + $0x10] sm:$0xff] (!%p1577_p7) }
  0x33   : > { %s2145_s12 = scalar_select %p309_p9, %s2070_s25, 1 }
  0x34   : > { %328 = sbr.rel (%p1577_p7) target bundleno = 59 (0x3b), region = 52  ;;  %338 = vst.msk [vmem:[%s2457_s6] sm:$0xff] (!%p1577_p7), %vm337_vm0, %v329_v0  ;;  %339 = vst.msk [vmem:[%s2457_s6 + $0x8] sm:$0xff] (!%p1577_p7), %vm337_vm0, %v330_v1  ;;  %v332_v3 = vld [vmem:[%s2451_s0 + $0x18] sm:$0xff] (!%p1577_p7)  ;;  %v333_v4 = vld [vmem:[%s2451_s0 + $0x20] sm:$0xff] (!%p1577_p7) }
  0x35   : > { %s1573_s24 = sshll.u32 %s2145_s12, 3  ;;  %s1613_s14 = sshll.u32 %s2145_s12, 5  ;;  %340 = vst.msk [vmem:[%s2457_s6 + $0x10] sm:$0xff] (!%p1577_p7), %vm337_vm0, %v331_v2  ;;  %v334_v5 = vld [vmem:[%s2451_s0 + $0x28] sm:$0xff] (!%p1577_p7)  ;;  %341 = vst.msk [vmem:[%s2457_s6 + $0x18] sm:$0xff] (!%p1577_p7), %vm337_vm0, %v332_v3  ;;  %v335_v6 = vld [vmem:[%s2451_s0 + $0x30] sm:$0xff] (!%p1577_p7) }
  0x36   : > { %s2152_s20 = scalar_lea.vmem %s2452_s1, %s1573_s24  ;;  %s2157_s30 = scalar_lea.vmem %s2453_s2, %s1573_s24  ;;  %342 = vst.msk [vmem:[%s2457_s6 + $0x20] sm:$0xff] (!%p1577_p7), %vm337_vm0, %v333_v4  ;;  %343 = vst.msk [vmem:[%s2457_s6 + $0x28] sm:$0xff] (!%p1577_p7), %vm337_vm0, %v334_v5  ;;  %v336_v7 = vld [vmem:[%s2451_s0 + $0x38] sm:$0xff] (!%p1577_p7) }
  0x37   : > { %s321_s8 = scalar_lea.vmem %s2454_s3, %s1613_s14  ;;  %s324_s11 = scalar_lea.vmem %s2456_s5, %s2145_s12  ;;  %344 = vst.msk [vmem:[%s2457_s6 + $0x30] sm:$0xff] (!%p1577_p7), %vm337_vm0, %v335_v6  ;;  %345 = vst.msk [vmem:[%s2457_s6 + $0x38] sm:$0xff] (!%p1577_p7), %vm337_vm0, %v336_v7 }
  0x3b PF: > { %v359_v8 = vld [vmem:[%s321_s8] sm:$0xff]  ;;  %v360_v9 = vld [vmem:[%s321_s8 + $0x8] sm:$0xff]  ;;  %v509_v10 = vld [vmem:[%s2137_s19] sm:$0xff]  ;;  %v2010_v12 = vmov 0.0|0.0   ;;  %vm347_vm1 = vcmask 261120   ;;  %vm2011_vm2 = vmmov 0  }
  0x3c   : > { %v1774_v11 = vpack.c.bf16 %v360_v9, %v359_v8  ;;  %1782 = vmatprep.subr.bf16.mxu1 %v2010_v12  ;;  %v510_v13 = vld [vmem:[%s2137_s19 + $0x8] sm:$0xff]  ;;  %v361_v14 = vld [vmem:[%s321_s8 + $0x10] sm:$0xff]  ;;  %v351_v18 = vld [vmem:[%s2457_s6] sm:$0xff]  ;;  %v2012_v21 = vmov 0.0   ;;  %s2013_s21 = smov 32   ;;  %s2014_s12 = smov 96  }
  0x3d   : > { %v362_v15 = vld [vmem:[%s321_s8 + $0x18] sm:$0xff]  ;;  %v2218_v16 = vpack.c.bf16 %v510_v13, %v509_v10  ;;  %v511_v19 = vld [vmem:[%s2137_s19 + $0x10] sm:$0xff]  ;;  %v512_v20 = vld [vmem:[%s2137_s19 + $0x18] sm:$0xff]  ;;  %1694 = vmatprep.mubr.msk.f32.mxu1 %vm2011_vm2, %v2012_v21  ;;  %1674 = vmatprep.mubr.msk.f32.mxu0 %vm347_vm1, %v351_v18 }
  0x3e   : > { %v1778_v17 = vpack.c.bf16 %v362_v15, %v361_v14  ;;  %1775 = vmatprep.subr.bf16.mxu0 %v1774_v11  ;;  %v346_v22 = vld [vmem:[%s2152_s20] sm:$0xff]  ;;  %v2230_v23 = vpack.c.bf16 %v512_v20, %v511_v19  ;;  %v352_v24 = vld [vmem:[%s2457_s6 + $0x8] sm:$0xff]  ;;  %v353_v5 = vld [vmem:[%s2457_s6 + $0x10] sm:$0xff] }
  0x3f   : > { %1777 = vmatpush3.bf16.msra.mxu0 %v1774_v11  ;;  %1784 = vmatpush3.bf16.msra.mxu1 %v2218_v16  ;;  %348 = vst.msk [vmem:[#allocation3] sm:$0xff] %vm347_vm1, %v346_v22  ;;  %v349_v26 = vld [vmem:[%s2157_s30] sm:$0xff]  ;;  %s2015_s30 = smov 64   ;;  %v354_v6 = vld [vmem:[%s2457_s6 + $0x18] sm:$0xff]  ;;  %v356_v8 = vld [vmem:[%s2457_s6 + $0x28] sm:$0xff] }
  0x40   : > { %1779 = vmatprep.subr.bf16.mxu0 %v1778_v17  ;;  %1785 = vmatprep.subr.bf16.mxu1 %v2010_v12  ;;  %350 = vst.msk [vmem:[#allocation4] sm:$0xff] %vm347_vm1, %v349_v26  ;;  %v2259_v27 = vld [vmem:[%s324_s11] ss:$0 sm:$0xff]  ;;  %v357_v9 = vld [vmem:[%s2457_s6 + $0x30] sm:$0xff]  ;;  %v358_v10 = vld [vmem:[%s2457_s6 + $0x38] sm:$0xff] }
  0x41   : > { %v355_v7 = vld [vmem:[%s2457_s6 + $0x20] sm:$0xff] }
  0x43   : > { %1781 = vmatpush3.bf16.msra.mxu0 %v1778_v17  ;;  %1787 = vmatpush3.bf16.msra.mxu1 %v2230_v23 }
  0x44   : > { %1788 = vmatprep.subr.bf16.mxu1 %v2010_v12  ;;  %1794 = vmatprep.subr.bf16.mxu0 %v2010_v12 }
  0x46   : > { %1675 = vmatmul.mubr.msk.f32.vlgmr.msra.gmra.mrb[0].mxu0 %vm347_vm1, %v352_v24  ;;  %v508_v25 = vld [vmem:[#allocation3] sm:$0xff] }
  0x47   : > { %1695 = vmatmul.mubr.msk.f32.vlgmr.msra.gmra.mrb[0].mxu1 %vm347_vm1, %v508_v25  ;;  %1796 = vmatpush3.bf16.msra.mxu0 %v2218_v16  ;;  %v594_v35 = vld [vmem:[#allocation4] sm:$0xff] }
  0x48   : > { %1790 = vmatpush3.bf16.msra.mxu1 %v2218_v16  ;;  %1705 = vmatprep.mubr.msk.f32.mxu1 %vm2011_vm2, %v2012_v21 }
  0x49   : > { %1791 = vmatprep.subr.bf16.mxu1 %v2010_v12  ;;  %1797 = vmatprep.subr.bf16.mxu0 %v2010_v12 }
  0x4a   : > { %1677 = vmatprep.mubr.msk.f32.mxu0 %vm347_vm1, %v353_v5 }
  0x4b   : > { %1799 = vmatpush3.bf16.msra.mxu0 %v2230_v23 }
  0x4c   : > { %1793 = vmatpush3.bf16.msra.mxu1 %v2230_v23  ;;  %1806 = vmatprep.subr.bf16.mxu0 %v2010_v12 }
  0x4d   : > { %1800 = vmatprep.subr.bf16.mxu1 %v2010_v12  ;;  %1678 = vmatmul.mubr.msk.f32.gmra.mrb[2].mxu0 %vm347_vm1, %v354_v6 }
  0x4e   : > { %1680 = vmatprep.mubr.msk.f32.mxu0 %vm347_vm1, %v355_v7 }
  0x51   : > { %1681 = vmatmul.mubr.msk.f32.gmra.mrb[4].mxu0 %vm347_vm1, %v356_v8 }
  0x52   : > { %1683 = vmatprep.mubr.msk.f32.mxu0 %vm347_vm1, %v357_v9 }
  0x55   : > { %1684 = vmatmul.mubr.msk.f32.gmra.mrb[6].mxu0 %vm347_vm1, %v358_v10 }
  0x56   : > { %1716 = vmatprep.mubr.msk.f32.mxu0 %vm2011_vm2, %v2012_v21 }
 0x119   : > { %v1676_v28 = vpop.f32.mrb[0].mxu0 }
 0x11a   : > { %v460_v29 = vpop.f32.mrb[1].mxu0  ;;  %v582_v30 = vpop.f32.mrb[0].mxu1  ;;  %v466_v53 = vadd.f32 %v1676_v28, %v2259_v27 }
 0x11b   : > { %v461_v31 = vadd.f32 %v2259_v27, %v460_v29  ;;  %v1696_v32 = vpop.f32.mrb[1].mxu1 }
 0x11d   : > { %v586_v33 = vadd.f32 %v582_v30, %v461_v31 }
 0x11f   : > { %1877 = vtanh.f32 %v586_v33  ;;  %v1588_v36 = vmul.f32 -1.442695, %v586_v33 }
 0x120   : > { %v1679_v17 = vpop.f32.mrb[2].mxu0 }
 0x121   : > { %1879 = vpow2.f32 %v1588_v36  ;;  %v470_v18 = vpop.f32.mrb[3].mxu0 }
 0x122   : > { %v471_v28 = vadd.f32 %v2259_v27, %v470_v18 }
 0x124   : > { %v2316_v19 = vpop.f32.mrb[4].mxu0 }
 0x125   : > { %v2318_v20 = vpop.f32.mrb[5].mxu0 }
 0x126   : > { %v481_v8 = vadd.f32 %v2259_v27, %v2318_v20 }
 0x128   : > { %v2332_v25 = vpop.f32.mrb[6].mxu0 }
 0x129   : > { %v1878_v34 = vpop.eup %1877  ;;  %v2334_v26 = vpop.f32.mrb[7].mxu0 }
 0x12a   : > { %601 = vrot.lane.b32.xlu0 %v1878_v34, %s2013_s21 }
 0x12b   : > { %v1880_v37 = vpop.eup %1879 }
 0x12c   : > { %v590_v38 = vadd.f32 1.0, %v1880_v37 }
 0x12e   : > { %596 = vrot.lane.b32.xlu0 %v594_v35, %s2013_s21  ;;  %1881 = vrcp.f32 %v590_v38 }
 0x138   : > { %v1882_v39 = vpop.eup %1881 }
 0x19c   : > { %v602_v40 = vpop.permute.xlu0 %601 }
 0x19d   : > { %v604_v41 = vmul.f32 %v1882_v39, %v602_v40 }
 0x19f   : > { %606 = vrot.lane.b32.xlu1 %v604_v41, %s2013_s21 }
 0x1a0   : > { %v597_v42 = vpop.permute.xlu0 %596 }
 0x1a1   : > { %v599_v43 = vmul.f32 %v1882_v39, %v597_v42 }
 0x211   : > { %v607_v44 = vpop.permute.xlu1 %606 }
 0x212   : > { %v609_v45 = vadd.f32 %v607_v44, %v599_v43 }
 0x214   : > { %1883 = vtanh.f32 %v609_v45 }
 0x21e   : > { %v1884_v46 = vpop.eup %1883 }
 0x21f   : > { %612 = vrot.lane.b32.xlu1 %v1884_v46, %s2013_s21 }
 0x223   : > { %617 = vrot.lane.b32.xlu1 %v609_v45, %s2014_s12 }
 0x291   : > { %v613_v47 = vpop.permute.xlu1 %612 }
 0x292   : > { %v615_v48 = vmul.f32 %v1882_v39, %v613_v47 }
 0x294   : > { %622 = vrot.lane.b32.xlu0 %v615_v48, %s2015_s30 }
 0x295   : > { %v618_v49 = vpop.permute.xlu1 %617 }
 0x296   : > { %620 = vst.msk [vmem:[#allocation4] sm:$0xff] %vm347_vm1, %v618_v49 }
 0x29d   : > { %v715_v50 = vld [vmem:[#allocation4] sm:$0xff] }
 0x29e   : > { %717 = vrot.lane.b32.xlu1 %v715_v50, %s2013_s21  ;;  %v476_v50 = vadd.f32 %v1679_v17, %v2259_v27 }
 0x306   : > { %v623_v51 = vpop.permute.xlu0 %622 }
 0x307   : > { %625 = vst.msk [vmem:[#allocation3] sm:$0xff] %vm347_vm1, %v623_v51  ;;  %626 = vst.msk [vmem:[%s2457_s6] sm:$0xff] %vm347_vm1, %v623_v51 }
 0x30e   : > { %v629_v52 = vld [vmem:[#allocation3] sm:$0xff] }
 0x30f   : > { %1706 = vmatmul.mubr.msk.f32.vlgmr.msra.gmra.mrb[2].mxu1 %vm347_vm1, %v629_v52 }
 0x310   : > { %1802 = vmatpush3.bf16.msra.mxu1 %v2218_v16  ;;  %1727 = vmatprep.mubr.msk.f32.mxu1 %vm2011_vm2, %v2012_v21  ;;  %v718_v0 = vpop.permute.xlu1 %717 }
 0x311   : > { %1803 = vmatprep.subr.bf16.mxu1 %v2010_v12 }
 0x314   : > { %1805 = vmatpush3.bf16.msra.mxu1 %v2230_v23 }
 0x315   : > { %1812 = vmatprep.subr.bf16.mxu1 %v2010_v12 }
 0x3e2   : > { %v703_v54 = vpop.f32.mrb[2].mxu1 }
 0x3e3   : > { %v707_v55 = vadd.f32 %v703_v54, %v466_v53  ;;  %v1707_v56 = vpop.f32.mrb[3].mxu1 }
 0x3e5   : > { %1885 = vtanh.f32 %v707_v55  ;;  %v1590_v58 = vmul.f32 -1.442695, %v707_v55 }
 0x3e7   : > { %1887 = vpow2.f32 %v1590_v58 }
 0x3ef   : > { %v1886_v57 = vpop.eup %1885 }
 0x3f0   : > { %722 = vrot.lane.b32.xlu0 %v1886_v57, %s2013_s21 }
 0x3f1   : > { %v1888_v59 = vpop.eup %1887 }
 0x3f2   : > { %v711_v60 = vadd.f32 1.0, %v1888_v59 }
 0x3f4   : > { %1889 = vrcp.f32 %v711_v60 }
 0x3fe   : > { %v1890_v61 = vpop.eup %1889 }
 0x3ff   : > { %v720_v1 = vmul.f32 %v1890_v61, %v718_v0 }
 0x462   : > { %v723_v62 = vpop.permute.xlu0 %722 }
 0x463   : > { %v725_v63 = vmul.f32 %v1890_v61, %v723_v62 }
 0x465   : > { %727 = vrot.lane.b32.xlu0 %v725_v63, %s2013_s21 }
 0x4d7   : > { %v728_v2 = vpop.permute.xlu0 %727 }
 0x4d8   : > { %v730_v3 = vadd.f32 %v728_v2, %v720_v1 }
 0x4da   : > { %1891 = vtanh.f32 %v730_v3 }
 0x4e4   : > { %v1892_v4 = vpop.eup %1891 }
 0x4e5   : > { %733 = vrot.lane.b32.xlu1 %v1892_v4, %s2013_s21 }
 0x4e9   : > { %738 = vrot.lane.b32.xlu1 %v730_v3, %s2014_s12 }
 0x557   : > { %v734_v11 = vpop.permute.xlu1 %733 }
 0x558   : > { %v736_v13 = vmul.f32 %v1890_v61, %v734_v11 }
 0x55a   : > { %743 = vrot.lane.b32.xlu0 %v736_v13, %s2015_s30 }
 0x55b   : > { %v739_v14 = vpop.permute.xlu1 %738 }
 0x55c   : > { %741 = vst.msk [vmem:[#allocation4] sm:$0xff] %vm347_vm1, %v739_v14 }
 0x563   : > { %v837_v15 = vld [vmem:[#allocation4] sm:$0xff] }
 0x564   : > { %839 = vrot.lane.b32.xlu1 %v837_v15, %s2013_s21 }
 0x5cc   : > { %v744_v22 = vpop.permute.xlu0 %743 }
 0x5cd   : > { %746 = vst.msk [vmem:[#allocation3] sm:$0xff] %vm347_vm1, %v744_v22  ;;  %1591 = vst.msk [vmem:[%s2457_s6 + $0x8] sm:$0xff] %vm347_vm1, %v744_v22 }
 0x5d4   : > { %v751_v24 = vld [vmem:[#allocation3] sm:$0xff] }
 0x5d5   : > { %1717 = vmatmul.mubr.msk.f32.vlgmr.msra.gmra.mrb[8].mxu0 %vm347_vm1, %v751_v24 }
 0x5d6   : > { %1808 = vmatpush3.bf16.msra.mxu0 %v2218_v16  ;;  %1738 = vmatprep.mubr.msk.f32.mxu0 %vm2011_vm2, %v2012_v21  ;;  %v840_v39 = vpop.permute.xlu1 %839 }
 0x5d7   : > { %1809 = vmatprep.subr.bf16.mxu0 %v2010_v12 }
 0x5da   : > { %1811 = vmatpush3.bf16.msra.mxu0 %v2230_v23 }
 0x5db   : > { %1818 = vmatprep.subr.bf16.mxu0 %v2010_v12 }
 0x6a8   : > { %v825_v29 = vpop.f32.mrb[8].mxu0 }
 0x6a9   : > { %v829_v30 = vadd.f32 %v825_v29, %v471_v28  ;;  %v1718_v31 = vpop.f32.mrb[9].mxu0 }
 0x6ab   : > { %1893 = vtanh.f32 %v829_v30  ;;  %v1593_v33 = vmul.f32 -1.442695, %v829_v30 }
 0x6ad   : > { %1895 = vpow2.f32 %v1593_v33 }
 0x6b5   : > { %v1894_v32 = vpop.eup %1893 }
 0x6b6   : > { %844 = vrot.lane.b32.xlu0 %v1894_v32, %s2013_s21 }
 0x6b7   : > { %v1896_v34 = vpop.eup %1895 }
 0x6b8   : > { %v833_v35 = vadd.f32 1.0, %v1896_v34 }
 0x6ba   : > { %1897 = vrcp.f32 %v833_v35 }
 0x6c4   : > { %v1898_v36 = vpop.eup %1897 }
 0x6c5   : > { %v842_v40 = vmul.f32 %v1898_v36, %v840_v39 }
 0x728   : > { %v845_v37 = vpop.permute.xlu0 %844 }
 0x729   : > { %v847_v38 = vmul.f32 %v1898_v36, %v845_v37 }
 0x72b   : > { %849 = vrot.lane.b32.xlu0 %v847_v38, %s2013_s21  ;;  %v486_v38 = vadd.f32 %v2316_v19, %v2259_v27 }
 0x79d   : > { %v850_v41 = vpop.permute.xlu0 %849 }
 0x79e   : > { %v852_v42 = vadd.f32 %v850_v41, %v842_v40 }
 0x7a0   : > { %1899 = vtanh.f32 %v852_v42 }
 0x7aa   : > { %v1900_v43 = vpop.eup %1899 }
 0x7ab   : > { %855 = vrot.lane.b32.xlu1 %v1900_v43, %s2013_s21 }
 0x7af   : > { %860 = vrot.lane.b32.xlu1 %v852_v42, %s2014_s12 }
 0x81d   : > { %v856_v44 = vpop.permute.xlu1 %855 }
 0x81e   : > { %v858_v45 = vmul.f32 %v1898_v36, %v856_v44 }
 0x820   : > { %865 = vrot.lane.b32.xlu0 %v858_v45, %s2015_s30 }
 0x821   : > { %v861_v46 = vpop.permute.xlu1 %860 }
 0x822   : > { %863 = vst.msk [vmem:[#allocation4] sm:$0xff] %vm347_vm1, %v861_v46 }
 0x829   : > { %v959_v47 = vld [vmem:[#allocation4] sm:$0xff] }
 0x82a   : > { %961 = vrot.lane.b32.xlu1 %v959_v47, %s2013_s21 }
 0x892   : > { %v866_v48 = vpop.permute.xlu0 %865 }
 0x893   : > { %868 = vst.msk [vmem:[#allocation3] sm:$0xff] %vm347_vm1, %v866_v48  ;;  %1594 = vst.msk [vmem:[%s2457_s6 + $0x10] sm:$0xff] %vm347_vm1, %v866_v48 }
 0x89a   : > { %v873_v49 = vld [vmem:[#allocation3] sm:$0xff] }
 0x89b   : > { %1728 = vmatmul.mubr.msk.f32.vlgmr.msra.gmra.mrb[4].mxu1 %vm347_vm1, %v873_v49 }
 0x89c   : > { %1814 = vmatpush3.bf16.msra.mxu1 %v2218_v16  ;;  %1749 = vmatprep.mubr.msk.f32.mxu1 %vm2011_vm2, %v2012_v21  ;;  %v962_v61 = vpop.permute.xlu1 %961 }
 0x89d   : > { %1815 = vmatprep.subr.bf16.mxu1 %v2010_v12 }
 0x8a0   : > { %1817 = vmatpush3.bf16.msra.mxu1 %v2230_v23 }
 0x8a1   : > { %1824 = vmatprep.subr.bf16.mxu1 %v2010_v12 }
 0x96e   : > { %v947_v51 = vpop.f32.mrb[4].mxu1 }
 0x96f   : > { %v951_v52 = vadd.f32 %v947_v51, %v476_v50  ;;  %v1729_v53 = vpop.f32.mrb[5].mxu1 }
 0x971   : > { %1901 = vtanh.f32 %v951_v52  ;;  %v1596_v55 = vmul.f32 -1.442695, %v951_v52 }
 0x973   : > { %1903 = vpow2.f32 %v1596_v55  ;;  %v491_v55 = vadd.f32 %v2259_v27, %v2334_v26 }
 0x97b   : > { %v1902_v54 = vpop.eup %1901 }
 0x97c   : > { %966 = vrot.lane.b32.xlu0 %v1902_v54, %s2013_s21 }
 0x97d   : > { %v1904_v56 = vpop.eup %1903 }
 0x97e   : > { %v955_v57 = vadd.f32 1.0, %v1904_v56 }
 0x980   : > { %1905 = vrcp.f32 %v955_v57 }
 0x98a   : > { %v1906_v58 = vpop.eup %1905 }
 0x98b   : > { %v964_v62 = vmul.f32 %v1906_v58, %v962_v61 }
 0x9ee   : > { %v967_v59 = vpop.permute.xlu0 %966 }
 0x9ef   : > { %v969_v60 = vmul.f32 %v1906_v58, %v967_v59 }
 0x9f1   : > { %971 = vrot.lane.b32.xlu0 %v969_v60, %s2013_s21 }
 0xa63   : > { %v972_v63 = vpop.permute.xlu0 %971 }
 0xa64   : > { %v974_v0 = vadd.f32 %v972_v63, %v964_v62 }
 0xa66   : > { %1907 = vtanh.f32 %v974_v0 }
 0xa70   : > { %v1908_v1 = vpop.eup %1907 }
 0xa71   : > { %977 = vrot.lane.b32.xlu1 %v1908_v1, %s2013_s21 }
 0xa75   : > { %982 = vrot.lane.b32.xlu1 %v974_v0, %s2014_s12 }
 0xae3   : > { %v978_v2 = vpop.permute.xlu1 %977 }
 0xae4   : > { %v980_v3 = vmul.f32 %v1906_v58, %v978_v2 }
 0xae6   : > { %987 = vrot.lane.b32.xlu0 %v980_v3, %s2015_s30 }
 0xae7   : > { %v983_v4 = vpop.permute.xlu1 %982 }
 0xae8   : > { %985 = vst.msk [vmem:[#allocation4] sm:$0xff] %vm347_vm1, %v983_v4 }
 0xaef   : > { %v1081_v5 = vld [vmem:[#allocation4] sm:$0xff] }
 0xaf0   : > { %1083 = vrot.lane.b32.xlu1 %v1081_v5, %s2013_s21 }
 0xb58   : > { %v988_v6 = vpop.permute.xlu0 %987 }
 0xb59   : > { %990 = vst.msk [vmem:[#allocation3] sm:$0xff] %vm347_vm1, %v988_v6  ;;  %1597 = vst.msk [vmem:[%s2457_s6 + $0x18] sm:$0xff] %vm347_vm1, %v988_v6 }
 0xb60   : > { %v995_v7 = vld [vmem:[#allocation3] sm:$0xff] }
 0xb61   : > { %1739 = vmatmul.mubr.msk.f32.vlgmr.msra.gmra.mrb[10].mxu0 %vm347_vm1, %v995_v7 }
 0xb62   : > { %1820 = vmatpush3.bf16.msra.mxu0 %v2218_v16  ;;  %1760 = vmatprep.mubr.msk.f32.mxu0 %vm2011_vm2, %v2012_v21  ;;  %v1084_v28 = vpop.permute.xlu1 %1083 }
 0xb63   : > { %1821 = vmatprep.subr.bf16.mxu0 %v2010_v12 }
 0xb66   : > { %1823 = vmatpush3.bf16.msra.mxu0 %v2230_v23 }
 0xc34   : > { %v1069_v9 = vpop.f32.mrb[10].mxu0 }
 0xc35   : > { %v1073_v10 = vadd.f32 %v1069_v9, %v481_v8  ;;  %v1740_v11 = vpop.f32.mrb[11].mxu0 }
 0xc37   : > { %1909 = vtanh.f32 %v1073_v10  ;;  %v1599_v14 = vmul.f32 -1.442695, %v1073_v10 }
 0xc39   : > { %1911 = vpow2.f32 %v1599_v14 }
 0xc41   : > { %v1910_v13 = vpop.eup %1909 }
 0xc42   : > { %1088 = vrot.lane.b32.xlu0 %v1910_v13, %s2013_s21  ;;  %v496_v13 = vadd.f32 %v2332_v25, %v2259_v27 }
 0xc43   : > { %v1912_v15 = vpop.eup %1911 }
 0xc44   : > { %v1077_v17 = vadd.f32 1.0, %v1912_v15 }
 0xc46   : > { %1913 = vrcp.f32 %v1077_v17 }
 0xc50   : > { %v1914_v18 = vpop.eup %1913 }
 0xc51   : > { %v1086_v29 = vmul.f32 %v1914_v18, %v1084_v28 }
 0xcb4   : > { %v1089_v22 = vpop.permute.xlu0 %1088 }
 0xcb5   : > { %v1091_v24 = vmul.f32 %v1914_v18, %v1089_v22 }
 0xcb7   : > { %1093 = vrot.lane.b32.xlu0 %v1091_v24, %s2013_s21 }
 0xd29   : > { %v1094_v20 = vpop.permute.xlu0 %1093 }
 0xd2a   : > { %v1096_v30 = vadd.f32 %v1094_v20, %v1086_v29 }
 0xd2c   : > { %1915 = vtanh.f32 %v1096_v30 }
 0xd36   : > { %v1916_v31 = vpop.eup %1915 }
 0xd37   : > { %1099 = vrot.lane.b32.xlu1 %v1916_v31, %s2013_s21 }
 0xd3b   : > { %1104 = vrot.lane.b32.xlu1 %v1096_v30, %s2014_s12 }
 0xda9   : > { %v1100_v32 = vpop.permute.xlu1 %1099 }
 0xdaa   : > { %v1102_v33 = vmul.f32 %v1914_v18, %v1100_v32 }
 0xdac   : > { %1109 = vrot.lane.b32.xlu0 %v1102_v33, %s2015_s30 }
 0xdad   : > { %v1105_v34 = vpop.permute.xlu1 %1104 }
 0xdae   : > { %1107 = vst.msk [vmem:[#allocation4] sm:$0xff] %vm347_vm1, %v1105_v34 }
 0xdb5   : > { %v1203_v35 = vld [vmem:[#allocation4] sm:$0xff] }
 0xdb6   : > { %1205 = vrot.lane.b32.xlu1 %v1203_v35, %s2013_s21 }
 0xe1e   : > { %v1110_v36 = vpop.permute.xlu0 %1109 }
 0xe1f   : > { %1112 = vst.msk [vmem:[#allocation3] sm:$0xff] %vm347_vm1, %v1110_v36  ;;  %1600 = vst.msk [vmem:[%s2457_s6 + $0x20] sm:$0xff] %vm347_vm1, %v1110_v36 }
 0xe26   : > { %v1117_v37 = vld [vmem:[#allocation3] sm:$0xff] }
 0xe27   : > { %1750 = vmatmul.mubr.msk.f32.vlgmr.msra.gmra.mrb[6].mxu1 %vm347_vm1, %v1117_v37 }
 0xe28   : > { %1826 = vmatpush3.bf16.msra.mxu1 %v2218_v16  ;;  %1771 = vmatprep.mubr.msk.f32.mxu1 %vm2011_vm2, %v2012_v21 }
 0xe29   : > { %1827 = vmatprep.subr.bf16.mxu1 %v2010_v12 }
 0xe2c   : > { %1829 = vmatpush3.bf16.msra.mxu1 %v2230_v23  ;;  %v1206_v23 = vpop.permute.xlu1 %1205 }
 0xefa   : > { %v1191_v39 = vpop.f32.mrb[6].mxu1 }
 0xefb   : > { %v1195_v40 = vadd.f32 %v1191_v39, %v486_v38  ;;  %v1751_v41 = vpop.f32.mrb[7].mxu1 }
 0xefd   : > { %1917 = vtanh.f32 %v1195_v40  ;;  %v1602_v43 = vmul.f32 -1.442695, %v1195_v40 }
 0xeff   : > { %1919 = vpow2.f32 %v1602_v43 }
 0xf07   : > { %v1918_v42 = vpop.eup %1917 }
 0xf08   : > { %1210 = vrot.lane.b32.xlu0 %v1918_v42, %s2013_s21 }
 0xf09   : > { %v1920_v16 = vpop.eup %1919 }
 0xf0a   : > { %v1199_v44 = vadd.f32 1.0, %v1920_v16 }
 0xf0c   : > { %1921 = vrcp.f32 %v1199_v44 }
 0xf16   : > { %v1922_v21 = vpop.eup %1921 }
 0xf17   : > { %v1208_v46 = vmul.f32 %v1922_v21, %v1206_v23 }
 0xf7a   : > { %v1211_v45 = vpop.permute.xlu0 %1210 }
 0xf7b   : > { %v1213_v12 = vmul.f32 %v1922_v21, %v1211_v45 }
 0xf7d   : > { %1215 = vrot.lane.b32.xlu0 %v1213_v12, %s2013_s21 }
 0xfef   : > { %v1216_v19 = vpop.permute.xlu0 %1215 }
 0xff0   : > { %v1218_v47 = vadd.f32 %v1216_v19, %v1208_v46 }
 0xff2   : > { %1923 = vtanh.f32 %v1218_v47 }
 0xffc   : > { %v1924_v48 = vpop.eup %1923 }
 0xffd   : > { %1221 = vrot.lane.b32.xlu1 %v1924_v48, %s2013_s21 }
0x1001   : > { %1226 = vrot.lane.b32.xlu1 %v1218_v47, %s2014_s12 }
0x106f   : > { %v1222_v49 = vpop.permute.xlu1 %1221 }
0x1070   : > { %v1224_v50 = vmul.f32 %v1922_v21, %v1222_v49 }
0x1072   : > { %1231 = vrot.lane.b32.xlu0 %v1224_v50, %s2015_s30 }
0x1073   : > { %v1227_v51 = vpop.permute.xlu1 %1226 }
0x1074   : > { %1229 = vst.msk [vmem:[#allocation4] sm:$0xff] %vm347_vm1, %v1227_v51 }
0x107b   : > { %v1325_v52 = vld [vmem:[#allocation4] sm:$0xff] }
0x107c   : > { %1327 = vrot.lane.b32.xlu1 %v1325_v52, %s2013_s21 }
0x10e4   : > { %v1232_v53 = vpop.permute.xlu0 %1231 }
0x10e5   : > { %1234 = vst.msk [vmem:[#allocation3] sm:$0xff] %vm347_vm1, %v1232_v53  ;;  %1603 = vst.msk [vmem:[%s2457_s6 + $0x28] sm:$0xff] %vm347_vm1, %v1232_v53 }
0x10ec   : > { %v1239_v54 = vld [vmem:[#allocation3] sm:$0xff] }
0x10ed   : > { %1761 = vmatmul.mubr.msk.f32.vlgmr.msra.gmra.mrb[12].mxu0 %vm347_vm1, %v1239_v54 }
0x10ee   : > { %v1328_v2 = vpop.permute.xlu1 %1327 }
0x11c0   : > { %v1313_v56 = vpop.f32.mrb[12].mxu0 }
0x11c1   : > { %v1317_v57 = vadd.f32 %v1313_v56, %v491_v55  ;;  %v1762_v58 = vpop.f32.mrb[13].mxu0 }
0x11c3   : > { %1925 = vtanh.f32 %v1317_v57  ;;  %v1605_v60 = vmul.f32 -1.442695, %v1317_v57 }
0x11c5   : > { %1927 = vpow2.f32 %v1605_v60 }
0x11cd   : > { %v1926_v59 = vpop.eup %1925 }
0x11ce   : > { %1332 = vrot.lane.b32.xlu0 %v1926_v59, %s2013_s21 }
0x11cf   : > { %v1928_v61 = vpop.eup %1927 }
0x11d0   : > { %v1321_v62 = vadd.f32 1.0, %v1928_v61 }
0x11d2   : > { %1929 = vrcp.f32 %v1321_v62 }
0x11dc   : > { %v1930_v63 = vpop.eup %1929 }
0x11dd   : > { %v1330_v3 = vmul.f32 %v1930_v63, %v1328_v2 }
0x1240   : > { %v1333_v0 = vpop.permute.xlu0 %1332 }
0x1241   : > { %v1335_v1 = vmul.f32 %v1930_v63, %v1333_v0 }
0x1243   : > { %1337 = vrot.lane.b32.xlu0 %v1335_v1, %s2013_s21 }
0x12b5   : > { %v1338_v26 = vpop.permute.xlu0 %1337 }
0x12b6   : > { %v1340_v4 = vadd.f32 %v1338_v26, %v1330_v3 }
0x12b8   : > { %1931 = vtanh.f32 %v1340_v4 }
0x12c2   : > { %v1932_v5 = vpop.eup %1931 }
0x12c3   : > { %1343 = vrot.lane.b32.xlu1 %v1932_v5, %s2013_s21 }
0x12c7   : > { %1348 = vrot.lane.b32.xlu1 %v1340_v4, %s2014_s12 }
0x1335   : > { %v1344_v6 = vpop.permute.xlu1 %1343 }
0x1336   : > { %v1346_v7 = vmul.f32 %v1930_v63, %v1344_v6 }
0x1338   : > { %1353 = vrot.lane.b32.xlu0 %v1346_v7, %s2015_s30 }
0x1339   : > { %v1349_v8 = vpop.permute.xlu1 %1348 }
0x133a   : > { %1351 = vst.msk [vmem:[#allocation4] sm:$0xff] %vm347_vm1, %v1349_v8 }
0x1341   : > { %v1447_v9 = vld [vmem:[#allocation4] sm:$0xff] }
0x1342   : > { %1449 = vrot.lane.b32.xlu1 %v1447_v9, %s2013_s21 }
0x13aa   : > { %v1354_v10 = vpop.permute.xlu0 %1353 }
0x13ab   : > { %1356 = vst.msk [vmem:[#allocation3] sm:$0xff] %vm347_vm1, %v1354_v10  ;;  %1606 = vst.msk [vmem:[%s2457_s6 + $0x30] sm:$0xff] %vm347_vm1, %v1354_v10 }
0x13b2   : > { %v1361_v11 = vld [vmem:[#allocation3] sm:$0xff] }
0x13b3   : > { %1772 = vmatmul.mubr.msk.f32.vlgmr.msra.gmra.mrb[8].mxu1 %vm347_vm1, %v1361_v11 }
0x13b4   : > { %v1450_v31 = vpop.permute.xlu1 %1449 }
0x1486   : > { %v1435_v14 = vpop.f32.mrb[8].mxu1 }
0x1487   : > { %v1439_v15 = vadd.f32 %v1435_v14, %v496_v13  ;;  %v1773_v17 = vpop.f32.mrb[9].mxu1 }
0x1489   : > { %1933 = vtanh.f32 %v1439_v15  ;;  %v1608_v22 = vmul.f32 -1.442695, %v1439_v15 }
0x148b   : > { %1935 = vpow2.f32 %v1608_v22 }
0x1493   : > { %v1934_v18 = vpop.eup %1933 }
0x1494   : > { %1454 = vrot.lane.b32.xlu0 %v1934_v18, %s2013_s21 }
0x1495   : > { %v1936_v24 = vpop.eup %1935 }
0x1496   : > { %v1443_v28 = vadd.f32 1.0, %v1936_v24 }
0x1498   : > { %1937 = vrcp.f32 %v1443_v28 }
0x14a2   : > { %v1938_v29 = vpop.eup %1937 }
0x14a3   : > { %v1452_v32 = vmul.f32 %v1938_v29, %v1450_v31 }
0x1506   : > { %v1455_v20 = vpop.permute.xlu0 %1454 }
0x1507   : > { %v1457_v30 = vmul.f32 %v1938_v29, %v1455_v20 }
0x1509   : > { %1459 = vrot.lane.b32.xlu0 %v1457_v30, %s2013_s21 }
0x157b   : > { %v1460_v27 = vpop.permute.xlu0 %1459 }
0x157c   : > { %v1462_v25 = vadd.f32 %v1460_v27, %v1452_v32 }
0x157e   : > { %1939 = vtanh.f32 %v1462_v25  ;;  %1470 = vrot.lane.b32.xlu0 %v1462_v25, %s2014_s12 }
0x1588   : > { %v1940_v33 = vpop.eup %1939 }
0x1589   : > { %1465 = vrot.lane.b32.xlu1 %v1940_v33, %s2013_s21 }
0x15f0   : > { %v1471_v34 = vpop.permute.xlu0 %1470 }
0x15f1   : > { %1473 = vst.msk [vmem:[#allocation4] sm:$0xff] %vm347_vm1, %v1471_v34 }
0x15fb   : > { %v1466_v35 = vpop.permute.xlu1 %1465 }
0x15fc   : > { %v1468_v36 = vmul.f32 %v1938_v29, %v1466_v35 }
0x15fe   : > { %1475 = vrot.lane.b32.xlu1 %v1468_v36, %s2015_s30 }
0x1670   : > { %v1476_v37 = vpop.permute.xlu1 %1475 }
0x1671   : > { %1478 = vst.msk [vmem:[#allocation3] sm:$0xff] %vm347_vm1, %v1476_v37  ;;  %1609 = vst.msk [vmem:[%s2457_s6 + $0x38] sm:$0xff] %vm347_vm1, %v1476_v37 }
0x1672 PF: > { %p16_p8 = scmp.ge.s32.totalorder %s2073_s26, 4   ;;  %s2461_s21 = smov %s1997_s22 }
0x1673   : > { %s2462_s22 = smov %s2001_s23  ;;  %s2463_s23 = smov %s2083_s29 }
0x1674   : > { %s2464_s24 = smov %s2073_s26  ;;  %18 = sbr.rel (!%p16_p8) target bundleno = 3 (0x3), region = 110 }
0x167b   :  { %1492 = vsyncpa [#allocation6], 1 }
0x167c   :  { %1494 = vsyncpa [#allocation6 + $0x1], 1 }

</bundles_post_ra>
